<compile_context>
chip_gen: v5e
topology: v5e:2x2
jax: 0.10.0
libtpu: 0.0.40
codegen_flags: <defaults>
</compile_context>

<pallas_src>
import functools
from math import prod

import jax
import jax.numpy as jnp
from jax.experimental import pallas as pl
from jax.experimental.pallas import tpu as pltpu


# ----------------------------- small helpers --------------------------------
def _round_up(x, m):
    return (x + m - 1) // m * m


def _pad2(x, m0, m1):
    p0 = _round_up(x.shape[0], m0) - x.shape[0]
    p1 = _round_up(x.shape[1], m1) - x.shape[1]
    if p0 or p1:
        x = jnp.pad(x, ((0, p0), (0, p1)))
    return x


# ----------------------------- activations (traced inside kernels) ----------
_SQRT_2_OVER_PI = 0.7978845608028654


def _gelu(x):
    # tanh-approx GELU (EUP tanh); ~1e-3 max abs deviation from exact erf GELU.
    return 0.5 * x * (1.0 + jnp.tanh(_SQRT_2_OVER_PI * (x + 0.044715 * x * x * x)))


def _leaky_relu(x):  # torch.nn.LeakyReLU(0.2)
    return jnp.where(x >= 0, x, 0.2 * x)


def _identity(x):
    return x


# ----------------------------- fused tiled matmul kernel --------------------
def _mm_kernel(a_ref, b_ref, bias_ref, o_ref, acc_ref, *, act):
    @pl.when(pl.program_id(2) == 0)
    def _init():
        acc_ref[...] = jnp.zeros_like(acc_ref)

    acc_ref[...] += jnp.dot(a_ref[...], b_ref[...],
                            preferred_element_type=jnp.float32)

    @pl.when(pl.program_id(2) == pl.num_programs(2) - 1)
    def _fin():
        o_ref[...] = act(acc_ref[...] + bias_ref[...]).astype(o_ref.dtype)


def _mm_res_kernel(a_ref, b_ref, bias_ref, r_ref, o_ref, acc_ref, *, act):
    @pl.when(pl.program_id(2) == 0)
    def _init():
        acc_ref[...] = jnp.zeros_like(acc_ref)

    acc_ref[...] += jnp.dot(a_ref[...], b_ref[...],
                            preferred_element_type=jnp.float32)

    @pl.when(pl.program_id(2) == pl.num_programs(2) - 1)
    def _fin():
        o_ref[...] = (act(acc_ref[...] + bias_ref[...])
                      + r_ref[...]).astype(o_ref.dtype)


def matmul_bias(a, b, bias=None, act=_identity, residual=None,
                tile_m=256, tile_n=256, tile_k=512):
    """Tiled, fused (a @ b + bias) -> act [+ residual] on the MXU.

    bf16 operands, f32 accumulation in a VMEM scratch, double-buffered
    BlockSpec pipeline; M/N grid axes are 'parallel' (megacore), K 'arbitrary'.
    """
    M, K = a.shape
    K2, N = b.shape
    assert K == K2
    tm = min(tile_m, _round_up(M, 16))    # 16 -> bf16 sublane packing safe
    tk = min(tile_k, _round_up(K, 128))
    tn = min(tile_n, _round_up(N, 128))   # lane-dense (>=128-wide) stores

    a_p = _pad2(a.astype(jnp.bfloat16), tm, tk)
    b_p = _pad2(b.astype(jnp.bfloat16), tk, tn)
    Mp, Kp = a_p.shape
    Np = b_p.shape[1]
    if bias is None:
        bias_p = jnp.zeros((1, Np), jnp.float32)
    else:
        bias_p = _pad2(bias.reshape(1, N).astype(jnp.float32), 1, tn)

    grid = (Mp // tm, Np // tn, Kp // tk)
    in_specs = [
        pl.BlockSpec((tm, tk), lambda i, j, k: (i, k)),
        pl.BlockSpec((tk, tn), lambda i, j, k: (k, j)),
        pl.BlockSpec((1, tn), lambda i, j, k: (0, j)),
    ]
    args = [a_p, b_p, bias_p]
    if residual is not None:
        r_p = _pad2(residual.astype(jnp.float32), tm, tn)
        in_specs.append(pl.BlockSpec((tm, tn), lambda i, j, k: (i, j)))
        args.append(r_p)
        kern = functools.partial(_mm_res_kernel, act=act)
    else:
        kern = functools.partial(_mm_kernel, act=act)

    out = pl.pallas_call(
        kern,
        out_shape=jax.ShapeDtypeStruct((Mp, Np), jnp.float32),
        grid_spec=pltpu.PrefetchScalarGridSpec(
            num_scalar_prefetch=0,
            grid=grid,
            in_specs=in_specs,
            out_specs=pl.BlockSpec((tm, tn), lambda i, j, k: (i, j)),
            scratch_shapes=[pltpu.VMEM((tm, tn), jnp.float32)],
        ),
        compiler_params=pltpu.CompilerParams(
            dimension_semantics=("parallel", "parallel", "arbitrary")),
    )(*args)
    return out[:M, :N]


# ----------------------------- conv wrappers (glue around the kernel) -------
def _im2col(x, KH, KW, dh, dw):
    N, Hp, Wp, Cin = x.shape
    OH = Hp - (KH - 1) * dh
    OW = Wp - (KW - 1) * dw
    cols = []
    for kh in range(KH):
        for kw in range(KW):
            cols.append(x[:, kh * dh:kh * dh + OH, kw * dw:kw * dw + OW, :])
    xcol = jnp.concatenate(cols, axis=-1)            # (N, OH, OW, KH*KW*Cin)
    return xcol.reshape(N * OH * OW, KH * KW * Cin), (N, OH, OW)


def conv2d(x, w, b, *, dilation=(1, 1), padding=((0, 0), (0, 0)),
           act=_identity, residual=None):
    """NHWC conv2d via im2col + fused Pallas matmul.  w: (KH, KW, Cin, Cout)."""
    # TODO(synk): im2col patches are still materialized by XLA glue; a fully
    # fused in-kernel im2col (kh/kw as extra reduction grid axes) would cut
    # activation traffic further.
    KH, KW, Cin, Cout = w.shape
    xp = jnp.pad(x, ((0, 0), padding[0], padding[1], (0, 0)))
    xcol, (N, OH, OW) = _im2col(xp, KH, KW, dilation[0], dilation[1])
    res = None if residual is None else residual.reshape(N * OH * OW, Cout)
    y = matmul_bias(xcol, w.reshape(KH * KW * Cin, Cout), b, act=act,
                    residual=res)
    return y.reshape(N, OH, OW, Cout)


def _phase_meta(stride, K, pad):
    """Sub-pixel decomposition of ConvTranspose2d: per output phase, the
    kernel tap order and (left, right) input padding of the equivalent
    stride-1 convolution on the un-upsampled input."""
    meta = []
    for ph in range(stride):
        ks = [k for k in range(K) if (k - ph - pad) % stride == 0]
        ds = [(k - ph - pad) // stride for k in ks]
        d_min, d_max = min(ds), max(ds)
        order = [ph + pad + (d_max - t) * stride
                 for t in range(d_max - d_min + 1)]
        meta.append((order, d_max, -d_min))
    return meta


def conv_transpose2d_subpixel(x, phase_weights, bias, stride, K, pad, act):
    """PyTorch ConvTranspose2d(stride=s, kernel=K, padding=pad) as s*s phase
    convolutions on the original input (no zero-upsampling), interleaved."""
    meta = _phase_meta(stride, K, pad)
    N, H, W, _ = x.shape
    rows = []
    for ph in range(stride):
        _, lp_h, rp_h = meta[ph]
        cols = []
        for pw in range(stride):
            _, lp_w, rp_w = meta[pw]
            cols.append(conv2d(x, phase_weights[ph][pw], bias,
                               padding=((lp_h, rp_h), (lp_w, rp_w)), act=act))
        rows.append(jnp.stack(cols, axis=3))         # (N, H, W, s, Cout)
    y = jnp.stack(rows, axis=2)                      # (N, H, s, W, s, Cout)
    Cout = y.shape[-1]
    return y.reshape(N, H * stride, W * stride, Cout)


# TODO(synk): Res2DBlock source is not provided; assumed structure is
# x + conv_n(act(...act(conv_1(x)))) with 'same' padding and dilation
# dilation_factor**layer_idx per layer.
def res2d_block(x, layers, cfg, act):
    h = x
    n = len(layers)
    for i, (w, b) in enumerate(layers):
        dil = cfg["dilation_factor"] ** i
        KH, KW = w.shape[0], w.shape[1]
        ph = (KH - 1) * dil // 2
        pw = (KW - 1) * dil // 2
        last = i == n - 1
        h = conv2d(h, w, b, dilation=(dil, dil), padding=((ph, ph), (pw, pw)),
                   act=_identity if last else act,
                   residual=x if last else None)      # residual fused in epilogue
    return h


# ----------------------------- ISTFT ('same' padding, Vocos-style) ----------
def make_istft_basis(n_fft, hop, win):
    # TODO(synk): only padding='same' is implemented; torch.istft 'center'
    # semantics are not reproduced.
    assert win == n_fft, "this implementation assumes win_length == n_fft"
    assert win % hop == 0, "overlap-add reshape trick needs hop | win"
    F = n_fft // 2 + 1
    n = jnp.arange(n_fft, dtype=jnp.float32)
    k = jnp.arange(F, dtype=jnp.float32)
    ang = 2.0 * jnp.pi * k[:, None] * n[None, :] / n_fft
    nyq = n_fft // 2
    coef_r = jnp.where((k == 0) | (k == nyq), 1.0, 2.0)[:, None]
    coef_i = jnp.where((k == 0) | (k == nyq), 0.0, 2.0)[:, None]
    basis_r = coef_r * jnp.cos(ang) / n_fft
    basis_i = -coef_i * jnp.sin(ang) / n_fft
    window = 0.5 * (1.0 - jnp.cos(2.0 * jnp.pi
                                  * jnp.arange(win, dtype=jnp.float32) / win))
    # fuse the synthesis window into the irfft basis: frames = [re|im] @ basis
    basis = jnp.concatenate([basis_r, basis_i], axis=0) * window[None, :]
    return basis, window


def make_inv_env(window, hop, T, win):
    r = win // hop
    wsq = (window ** 2).reshape(r, hop)
    env = jnp.zeros((T + r - 1, hop), jnp.float32)
    for p in range(r):
        env = env.at[p:p + T, :].add(jnp.broadcast_to(wsq[p], (T, hop)))
    env = env.reshape(-1)
    trim = (win - hop) // 2
    env = env[trim:trim + T * hop]
    return jnp.where(env > 1e-11, 1.0 / env, 0.0)     # epsilon-safe reciprocal


def overlap_add(frames, hop):
    """frames: (B, T, win) windowed frames -> (B, (T-1)*hop + win)."""
    B, T, win = frames.shape
    r = win // hop
    fr = frames.reshape(B, T, r, hop)
    y = jnp.zeros((B, T + r - 1, hop), frames.dtype)
    for p in range(r):
        y = y.at[:, p:p + T, :].add(fr[:, :, p, :])
    return y.reshape(B, (T + r - 1) * hop)


# ----------------------------- fused end_conv (+1/env) Pallas kernel --------
def _end_conv_kernel(x_ref, env_ref, w1_ref, b1_ref, w2_ref, b2_ref,
                     w3_ref, b3_ref, o_ref, *, halo, ts):
    lb = x_ref.shape[-1]
    x = x_ref[...].reshape(1, lb) * env_ref[...].reshape(1, lb)   # 1/env folded
    x_m = jnp.roll(x, 1, axis=1)      # x[n-1]
    x_p = jnp.roll(x, -1, axis=1)     # x[n+1]

    # Conv1d(1 -> C, k=3, pad=1) + LeakyReLU : VPU broadcasts (K=3 would
    # starve the MXU contraction dimension).
    h1 = (w1_ref[0] * x_m + w1_ref[1] * x + w1_ref[2] * x_p) + b1_ref[...]
    h1 = _leaky_relu(h1)                                          # (C, lb)

    # Conv1d(C -> C, k=3, pad=1) + LeakyReLU : three (C,C)@(C,lb) matmuls.
    h1_m = jnp.roll(h1, 1, axis=1)
    h1_p = jnp.roll(h1, -1, axis=1)
    h2 = (jnp.dot(w2_ref[0], h1_m, preferred_element_type=jnp.float32)
          + jnp.dot(w2_ref[1], h1, preferred_element_type=jnp.float32)
          + jnp.dot(w2_ref[2], h1_p, preferred_element_type=jnp.float32)
          + b2_ref[...])
    h2 = _leaky_relu(h2)                                          # (C, lb)

    # Conv1d(C -> 1, k=3, pad=1)
    h2_m = jnp.roll(h2, 1, axis=1)
    h2_p = jnp.roll(h2, -1, axis=1)
    y = (jnp.dot(w3_ref[0], h2_m, preferred_element_type=jnp.float32)
         + jnp.dot(w3_ref[1], h2, preferred_element_type=jnp.float32)
         + jnp.dot(w3_ref[2], h2_p, preferred_element_type=jnp.float32)
         + b3_ref[...])                                           # (1, lb)

    o_ref[...] = y[:, halo:halo + ts].reshape(1, 1, 1, ts)


def end_conv_fused(y, inv_env, ecp, *, tile_s=2048, halo=128):
    """All three Conv1d layers + LeakyReLUs + the ISTFT 1/envelope in one
    Pallas kernel; the waveform is processed in halo'd sample tiles and the
    hidden activations never leave VMEM."""
    B, S = y.shape
    ts = min(tile_s, _round_up(S, 128))
    Sp = _round_up(S, ts)
    n_blk = Sp // ts
    Lb = ts + 2 * halo
    ypad = jnp.pad(y, ((0, 0), (halo, halo + Sp - S)))
    epad = jnp.pad(inv_env, (halo, halo + Sp - S))
    xblocks = jnp.stack([ypad[:, i * ts:i * ts + Lb] for i in range(n_blk)],
                        axis=1)[:, :, None, :]                    # (B, n_blk, 1, Lb)
    eblocks = jnp.stack([epad[i * ts:i * ts + Lb] for i in range(n_blk)],
                        axis=0)[:, None, :]                       # (n_blk, 1, Lb)
    C = ecp["w2"].shape[1]
    kern = functools.partial(_end_conv_kernel, halo=halo, ts=ts)
    out = pl.pallas_call(
        kern,
        out_shape=jax.ShapeDtypeStruct((B, n_blk, 1, ts), jnp.float32),
        grid_spec=pltpu.PrefetchScalarGridSpec(
            num_scalar_prefetch=0,
            grid=(B, n_blk),
            in_specs=[
                pl.BlockSpec((1, 1, 1, Lb), lambda b, j: (b, j, 0, 0)),
                pl.BlockSpec((1, 1, Lb), lambda b, j: (j, 0, 0)),
                pl.BlockSpec((3, C, 1), lambda b, j: (0, 0, 0)),
                pl.BlockSpec((C, 1), lambda b, j: (0, 0)),
                pl.BlockSpec((3, C, C), lambda b, j: (0, 0, 0)),
                pl.BlockSpec((C, 1), lambda b, j: (0, 0)),
                pl.BlockSpec((3, 1, C), lambda b, j: (0, 0, 0)),
                pl.BlockSpec((1, 1), lambda b, j: (0, 0)),
            ],
            out_specs=pl.BlockSpec((1, 1, 1, ts), lambda b, j: (b, j, 0, 0)),
        ),
        compiler_params=pltpu.CompilerParams(
            dimension_semantics=("parallel", "parallel")),
    )(xblocks, eblocks, ecp["w1"], ecp["b1"], ecp["w2"], ecp["b2"],
      ecp["w3"], ecp["b3"])
    return out.reshape(B, Sp)[:, :S]


# ----------------------------- full decoder forward --------------------------
def stft_decoder_forward(z, params, cfg):
    """z: (B, channel_list[0], L) float32 (PyTorch layout).
    Returns (B, 1, L * prod(dim_change_list) * hop_length)."""
    B, C0, L = z.shape
    x = jnp.transpose(z, (0, 2, 1))[:, :, None, :]        # NCHW -> NHWC (B, L, 1, C0)

    for idx, stride in enumerate(cfg["dim_change_list"]):
        if idx > 0:                                        # conv_list[0] is nn.Identity
            x = res2d_block(x, params["res_blocks"][idx - 1], cfg, _gelu)
        # dropout: identity (inference)
        K = stride + cfg["dim_add_kernel_add"]
        pad = cfg["dim_add_kernel_add"] // 2
        dc = params["dim_change"][idx]
        x = conv_transpose2d_subpixel(x, dc["phases"], dc["bias"],
                                      stride, K, pad, act=_gelu)

    # torch: z.transpose(1,2).flatten(2)  ==  NHWC -> (B, H, C*W), C outer, W inner
    _, H, W, C = x.shape
    feat = jnp.transpose(x, (0, 1, 3, 2)).reshape(B * H, C * W)
    # dropout: identity

    # Linear proj fused with irfft(+window) basis: one matmul, lane-dense N.
    frames = matmul_bias(feat, params["proj_w"], params["proj_b"])
    frames = frames.reshape(B, H, cfg["n_fft"])

    y = overlap_add(frames, cfg["hop_length"])             # reshape-trick OLA
    trim = (cfg["win_length"] - cfg["hop_length"]) // 2
    y = y[:, trim:trim + H * cfg["hop_length"]]            # 'same' padding trim

    wav = end_conv_fused(y, params["inv_env"], params["end_conv"])
    return wav[:, None, :]                                 # (B, 1, samples)


# ----------------------------- parameter init / preparation ------------------
def init_params(key, cfg):
    """Deterministic raw parameters in PyTorch-equivalent layouts."""
    channel_list = cfg["channel_list"]
    dcl = cfg["dim_change_list"]
    ks = cfg["kernel_size"]
    keys = iter(jax.random.split(key, 64))

    def nrm(shape, fan_in):
        return (jax.random.normal(next(keys), shape, jnp.float32)
                / jnp.sqrt(float(fan_in)))

    raw = {}
    raw["dim_change"] = []
    for i, s in enumerate(dcl):
        cin, cout = channel_list[i], channel_list[i + 1]
        K = s + cfg["dim_add_kernel_add"]
        raw["dim_change"].append((nrm((cin, cout, K, K), cin * K * K),
                                  nrm((cout,), cin * K * K)))
    raw["res_blocks"] = []
    for i in range(1, len(dcl)):
        Cc = channel_list[i]
        layers = [(nrm((ks, ks, Cc, Cc), Cc * ks * ks),      # HWIO
                   nrm((Cc,), Cc * ks * ks))
                  for _ in range(cfg["num_res_block_conv"])]
        raw["res_blocks"].append(layers)
    din = prod(dcl) * channel_list[-1]
    F = cfg["n_fft"] // 2 + 1
    raw["proj"] = (nrm((din, 2 * F), din), nrm((2 * F,), din))
    hd = cfg["output_conv_hidden_dim"]
    raw["end_conv"] = [                                      # torch Conv1d layout
        (nrm((hd, 1, 3), 3), nrm((hd,), 3)),
        (nrm((hd, hd, 3), 3 * hd), nrm((hd,), 3 * hd)),
        (nrm((1, hd, 3), 3 * hd), nrm((1,), 3 * hd)),
    ]
    return raw


def prepare_params(raw, cfg, T):
    """Precompute all derived / fused weights once (outside the jitted fwd)."""
    p = {}
    # sub-pixel phase weights for each ConvTranspose2d
    p["dim_change"] = []
    for i, s in enumerate(cfg["dim_change_list"]):
        w_t, b = raw["dim_change"][i]                        # (Cin, Cout, K, K)
        K = s + cfg["dim_add_kernel_add"]
        pad = cfg["dim_add_kernel_add"] // 2
        meta = _phase_meta(s, K, pad)
        phases = []
        for ph in range(s):
            kh_o, _, _ = meta[ph]
            row = []
            for pw in range(s):
                kw_o, _, _ = meta[pw]
                wp = w_t[:, :, kh_o, :][:, :, :, kw_o]       # (Cin, Cout, Th, Tw)
                row.append(jnp.transpose(wp, (2, 3, 0, 1)))  # HWIO
            phases.append(row)
        p["dim_change"].append({"phases": phases, "bias": b})

    p["res_blocks"] = raw["res_blocks"]

    # fuse Linear proj with the iRFFT(+window) synthesis basis
    basis, window = make_istft_basis(cfg["n_fft"], cfg["hop_length"],
                                     cfg["win_length"])
    wp_, bp_ = raw["proj"]
    p["proj_w"] = wp_ @ basis                                # (din, n_fft)
    p["proj_b"] = bp_ @ basis                                # (n_fft,)
    p["inv_env"] = make_inv_env(window, cfg["hop_length"], T,
                                cfg["win_length"])

    # end-conv weights re-laid-out for the fused kernel
    (w1, b1), (w2, b2), (w3, b3) = raw["end_conv"]
    p["end_conv"] = {
        "w1": jnp.transpose(w1, (2, 0, 1)),                  # (3, C, 1)
        "b1": b1.reshape(-1, 1),                             # (C, 1)
        "w2": jnp.transpose(w2, (2, 0, 1)),                  # (3, C, C)
        "b2": b2.reshape(-1, 1),                             # (C, 1)
        "w3": jnp.transpose(w3, (2, 0, 1)),                  # (3, 1, C)
        "b3": b3.reshape(1, 1),                              # (1, 1)
    }
    return p


# ----------------------------- main ------------------------------------------
if __name__ == "__main__":
    cfg = dict(
        channel_list=[8, 8, 4],
        dim_change_list=[2, 2],
        kernel_size=3,
        dim_add_kernel_add=2,
        num_res_block_conv=2,
        n_fft=16,
        hop_length=4,
        win_length=16,
        output_conv_hidden_dim=32,
        dilation_factor=1,
        dropout=0.1,            # inference: identity
    )
    key = jax.random.PRNGKey(0)
    kp, kz = jax.random.split(key)
    raw = init_params(kp, cfg)

    B, L = 2, 8
    z = jax.random.normal(kz, (B, cfg["channel_list"][0], L), jnp.float32)

    T = L * prod(cfg["dim_change_list"])
    params = prepare_params(raw, cfg, T)

    fwd = jax.jit(lambda zz, pp: stft_decoder_forward(zz, pp, cfg))
    out = jax.block_until_ready(fwd(z, params))

    assert out.shape == (B, 1, T * cfg["hop_length"]), out.shape
    assert bool(jnp.all(jnp.isfinite(out)))
    print("KERNEL_OK")
</pallas_src>

<mosaic_0001>
module attributes {stable_mosaic.version = 11 : i64} {
  func.func @_mm_kernel(%arg0: i32, %arg1: i32, %arg2: i32, %arg3: memref<16x128xbf16, #tpu.memory_space<vmem>>, %arg4: memref<128x128xbf16, #tpu.memory_space<vmem>>, %arg5: memref<1x128xf32, #tpu.memory_space<vmem>>, %arg6: memref<16x128xf32, #tpu.memory_space<vmem>>, %arg7: memref<16x128xf32, #tpu.memory_space<vmem>>) attributes {dimension_semantics = [#tpu.dimension_semantics<parallel>, #tpu.dimension_semantics<parallel>, #tpu.dimension_semantics<arbitrary>], iteration_bounds = array<i64: 1, 1, 1>, scalar_prefetch = 0 : i64, scratch_operands = 1 : i64, tpu.core_type = #tpu.core_type<tc>, window_params = [{transform_indices = @transform_0, window_bounds = array<i64: 16, 128>}, {transform_indices = @transform_1, window_bounds = array<i64: 128, 128>}, {transform_indices = @transform_2, window_bounds = array<i64: 1, 128>}, {transform_indices = @transform_3, window_bounds = array<i64: 16, 128>}]} {
    %c0_i32 = arith.constant 0 : i32
    %0 = arith.cmpi eq, %arg2, %c0_i32 : i32
    %1 = arith.extui %0 : i1 to i32
    %c0_i32_0 = arith.constant 0 : i32
    %2 = arith.cmpi ne, %1, %c0_i32_0 : i32
    scf.if %2 {
      %cst_10 = arith.constant 0.000000e+00 : f32
      %12 = vector.broadcast %cst_10 : f32 to vector<16x128xf32>
      %c0_11 = arith.constant 0 : index
      %c0_12 = arith.constant 0 : index
      %13 = vector.load %arg7[%c0_11, %c0_12] : memref<16x128xf32, #tpu.memory_space<vmem>>, vector<16x128xf32>
      tpu.vector_store %arg7[%c0_11, %c0_12], %12 {strides = array<i32>} : memref<16x128xf32, #tpu.memory_space<vmem>>, vector<16x128xf32>,
    } else {
    }
    %c0 = arith.constant 0 : index
    %c0_1 = arith.constant 0 : index
    %3 = vector.load %arg7[%c0, %c0_1] : memref<16x128xf32, #tpu.memory_space<vmem>>, vector<16x128xf32>
    %c0_2 = arith.constant 0 : index
    %c0_3 = arith.constant 0 : index
    %4 = vector.load %arg3[%c0_2, %c0_3] : memref<16x128xbf16, #tpu.memory_space<vmem>>, vector<16x128xbf16>
    %c0_4 = arith.constant 0 : index
    %c0_5 = arith.constant 0 : index
    %5 = vector.load %arg4[%c0_4, %c0_5] : memref<128x128xbf16, #tpu.memory_space<vmem>>, vector<128x128xbf16>
    %cst = arith.constant dense<0.000000e+00> : vector<16x128xf32>
    %6 = tpu.matmul %4, %5, %cst {dimension_numbers = #tpu.dot_dimension_numbers<[1], [0], [0], [1], [0, 0, 1, 1], [], []>} : vector<16x128xbf16>, vector<128x128xbf16>, vector<16x128xf32> -> vector<16x128xf32>
    %7 = arith.addf %3, %6 : vector<16x128xf32>
    %c0_6 = arith.constant 0 : index
    %c0_7 = arith.constant 0 : index
    %8 = vector.load %arg7[%c0_6, %c0_7] : memref<16x128xf32, #tpu.memory_space<vmem>>, vector<16x128xf32>
    tpu.vector_store %arg7[%c0_6, %c0_7], %7 {strides = array<i32>} : memref<16x128xf32, #tpu.memory_space<vmem>>, vector<16x128xf32>,
    %c0_i32_8 = arith.constant 0 : i32
    %9 = arith.cmpi eq, %arg2, %c0_i32_8 : i32
    %10 = arith.extui %9 : i1 to i32
    %c0_i32_9 = arith.constant 0 : i32
    %11 = arith.cmpi ne, %10, %c0_i32_9 : i32
    scf.if %11 {
      %c0_10 = arith.constant 0 : index
      %c0_11 = arith.constant 0 : index
      %12 = vector.load %arg7[%c0_10, %c0_11] : memref<16x128xf32, #tpu.memory_space<vmem>>, vector<16x128xf32>
      %c0_12 = arith.constant 0 : index
      %c0_13 = arith.constant 0 : index
      %13 = vector.load %arg5[%c0_12, %c0_13] : memref<1x128xf32, #tpu.memory_space<vmem>>, vector<1x128xf32>
      %14 = vector.broadcast %13 : vector<1x128xf32> to vector<16x128xf32>
      %15 = arith.addf %12, %14 : vector<16x128xf32>
      %cst_14 = arith.constant 5.000000e-01 : f32
      %16 = vector.broadcast %cst_14 : f32 to vector<16x128xf32>
      %17 = arith.mulf %16, %15 : vector<16x128xf32>
      %cst_15 = arith.constant 4.471500e-02 : f32
      %18 = vector.broadcast %cst_15 : f32 to vector<16x128xf32>
      %19 = arith.mulf %18, %15 : vector<16x128xf32>
      %20 = arith.mulf %19, %15 : vector<16x128xf32>
      %21 = arith.mulf %20, %15 : vector<16x128xf32>
      %22 = arith.addf %15, %21 : vector<16x128xf32>
      %cst_16 = arith.constant 0.797884583 : f32
      %23 = vector.broadcast %cst_16 : f32 to vector<16x128xf32>
      %24 = arith.mulf %23, %22 : vector<16x128xf32>
      %25 = math.tanh %24 : vector<16x128xf32>
      %cst_17 = arith.constant 1.000000e+00 : f32
      %26 = vector.broadcast %cst_17 : f32 to vector<16x128xf32>
      %27 = arith.addf %26, %25 : vector<16x128xf32>
      %28 = arith.mulf %17, %27 : vector<16x128xf32>
      %c0_18 = arith.constant 0 : index
      %c0_19 = arith.constant 0 : index
      %29 = vector.load %arg6[%c0_18, %c0_19] : memref<16x128xf32, #tpu.memory_space<vmem>>, vector<16x128xf32>
      tpu.vector_store %arg6[%c0_18, %c0_19], %28 {strides = array<i32>} : memref<16x128xf32, #tpu.memory_space<vmem>>, vector<16x128xf32>,
    } else {
    }
    return
  }
  func.func @transform_0(%arg0: i32, %arg1: i32, %arg2: i32) -> (i32, i32) {
    %c0_i32 = arith.constant 0 : i32
    return %arg0, %arg2 : i32, i32
  }
  func.func @transform_1(%arg0: i32, %arg1: i32, %arg2: i32) -> (i32, i32) {
    %c0_i32 = arith.constant 0 : i32
    return %arg2, %arg1 : i32, i32
  }
  func.func @transform_2(%arg0: i32, %arg1: i32, %arg2: i32) -> (i32, i32) {
    %c0_i32 = arith.constant 0 : i32
    %c0_i32_0 = arith.constant 0 : i32
    return %c0_i32, %arg1 : i32, i32
  }
  func.func @transform_3(%arg0: i32, %arg1: i32, %arg2: i32) -> (i32, i32) {
    %c0_i32 = arith.constant 0 : i32
    return %arg0, %arg1 : i32, i32
  }
}

module attributes {stable_mosaic.version = 11 : i64} {
  func.func @_mm_kernel(%arg0: i32, %arg1: i32, %arg2: i32, %arg3: memref<64x128xbf16, #tpu.memory_space<vmem>>, %arg4: memref<128x128xbf16, #tpu.memory_space<vmem>>, %arg5: memref<1x128xf32, #tpu.memory_space<vmem>>, %arg6: memref<64x128xf32, #tpu.memory_space<vmem>>, %arg7: memref<64x128xf32, #tpu.memory_space<vmem>>) attributes {dimension_semantics = [#tpu.dimension_semantics<parallel>, #tpu.dimension_semantics<parallel>, #tpu.dimension_semantics<arbitrary>], iteration_bounds = array<i64: 1, 1, 1>, scalar_prefetch = 0 : i64, scratch_operands = 1 : i64, tpu.core_type = #tpu.core_type<tc>, window_params = [{transform_indices = @transform_0, window_bounds = array<i64: 64, 128>}, {transform_indices = @transform_1, window_bounds = array<i64: 128, 128>}, {transform_indices = @transform_2, window_bounds = array<i64: 1, 128>}, {transform_indices = @transform_3, window_bounds = array<i64: 64, 128>}]} {
    %c0_i32 = arith.constant 0 : i32
    %0 = arith.cmpi eq, %arg2, %c0_i32 : i32
    %1 = arith.extui %0 : i1 to i32
    %c0_i32_0 = arith.constant 0 : i32
    %2 = arith.cmpi ne, %1, %c0_i32_0 : i32
    scf.if %2 {
      %cst_10 = arith.constant 0.000000e+00 : f32
      %12 = vector.broadcast %cst_10 : f32 to vector<64x128xf32>
      %c0_11 = arith.constant 0 : index
      %c0_12 = arith.constant 0 : index
      %13 = vector.load %arg7[%c0_11, %c0_12] : memref<64x128xf32, #tpu.memory_space<vmem>>, vector<64x128xf32>
      tpu.vector_store %arg7[%c0_11, %c0_12], %12 {strides = array<i32>} : memref<64x128xf32, #tpu.memory_space<vmem>>, vector<64x128xf32>,
    } else {
    }
    %c0 = arith.constant 0 : index
    %c0_1 = arith.constant 0 : index
    %3 = vector.load %arg7[%c0, %c0_1] : memref<64x128xf32, #tpu.memory_space<vmem>>, vector<64x128xf32>
    %c0_2 = arith.constant 0 : index
    %c0_3 = arith.constant 0 : index
    %4 = vector.load %arg3[%c0_2, %c0_3] : memref<64x128xbf16, #tpu.memory_space<vmem>>, vector<64x128xbf16>
    %c0_4 = arith.constant 0 : index
    %c0_5 = arith.constant 0 : index
    %5 = vector.load %arg4[%c0_4, %c0_5] : memref<128x128xbf16, #tpu.memory_space<vmem>>, vector<128x128xbf16>
    %cst = arith.constant dense<0.000000e+00> : vector<64x128xf32>
    %6 = tpu.matmul %4, %5, %cst {dimension_numbers = #tpu.dot_dimension_numbers<[1], [0], [0], [1], [0, 0, 1, 1], [], []>} : vector<64x128xbf16>, vector<128x128xbf16>, vector<64x128xf32> -> vector<64x128xf32>
    %7 = arith.addf %3, %6 : vector<64x128xf32>
    %c0_6 = arith.constant 0 : index
    %c0_7 = arith.constant 0 : index
    %8 = vector.load %arg7[%c0_6, %c0_7] : memref<64x128xf32, #tpu.memory_space<vmem>>, vector<64x128xf32>
    tpu.vector_store %arg7[%c0_6, %c0_7], %7 {strides = array<i32>} : memref<64x128xf32, #tpu.memory_space<vmem>>, vector<64x128xf32>,
    %c0_i32_8 = arith.constant 0 : i32
    %9 = arith.cmpi eq, %arg2, %c0_i32_8 : i32
    %10 = arith.extui %9 : i1 to i32
    %c0_i32_9 = arith.constant 0 : i32
    %11 = arith.cmpi ne, %10, %c0_i32_9 : i32
    scf.if %11 {
      %c0_10 = arith.constant 0 : index
      %c0_11 = arith.constant 0 : index
      %12 = vector.load %arg7[%c0_10, %c0_11] : memref<64x128xf32, #tpu.memory_space<vmem>>, vector<64x128xf32>
      %c0_12 = arith.constant 0 : index
      %c0_13 = arith.constant 0 : index
      %13 = vector.load %arg5[%c0_12, %c0_13] : memref<1x128xf32, #tpu.memory_space<vmem>>, vector<1x128xf32>
      %14 = vector.broadcast %13 : vector<1x128xf32> to vector<64x128xf32>
      %15 = arith.addf %12, %14 : vector<64x128xf32>
      %cst_14 = arith.constant 5.000000e-01 : f32
      %16 = vector.broadcast %cst_14 : f32 to vector<64x128xf32>
      %17 = arith.mulf %16, %15 : vector<64x128xf32>
      %cst_15 = arith.constant 4.471500e-02 : f32
      %18 = vector.broadcast %cst_15 : f32 to vector<64x128xf32>
      %19 = arith.mulf %18, %15 : vector<64x128xf32>
      %20 = arith.mulf %19, %15 : vector<64x128xf32>
      %21 = arith.mulf %20, %15 : vector<64x128xf32>
      %22 = arith.addf %15, %21 : vector<64x128xf32>
      %cst_16 = arith.constant 0.797884583 : f32
      %23 = vector.broadcast %cst_16 : f32 to vector<64x128xf32>
      %24 = arith.mulf %23, %22 : vector<64x128xf32>
      %25 = math.tanh %24 : vector<64x128xf32>
      %cst_17 = arith.constant 1.000000e+00 : f32
      %26 = vector.broadcast %cst_17 : f32 to vector<64x128xf32>
      %27 = arith.addf %26, %25 : vector<64x128xf32>
      %28 = arith.mulf %17, %27 : vector<64x128xf32>
      %c0_18 = arith.constant 0 : index
      %c0_19 = arith.constant 0 : index
      %29 = vector.load %arg6[%c0_18, %c0_19] : memref<64x128xf32, #tpu.memory_space<vmem>>, vector<64x128xf32>
      tpu.vector_store %arg6[%c0_18, %c0_19], %28 {strides = array<i32>} : memref<64x128xf32, #tpu.memory_space<vmem>>, vector<64x128xf32>,
    } else {
    }
    return
  }
  func.func @transform_0(%arg0: i32, %arg1: i32, %arg2: i32) -> (i32, i32) {
    %c0_i32 = arith.constant 0 : i32
    return %arg0, %arg2 : i32, i32
  }
  func.func @transform_1(%arg0: i32, %arg1: i32, %arg2: i32) -> (i32, i32) {
    %c0_i32 = arith.constant 0 : i32
    return %arg2, %arg1 : i32, i32
  }
  func.func @transform_2(%arg0: i32, %arg1: i32, %arg2: i32) -> (i32, i32) {
    %c0_i32 = arith.constant 0 : i32
    %c0_i32_0 = arith.constant 0 : i32
    return %c0_i32, %arg1 : i32, i32
  }
  func.func @transform_3(%arg0: i32, %arg1: i32, %arg2: i32) -> (i32, i32) {
    %c0_i32 = arith.constant 0 : i32
    return %arg0, %arg1 : i32, i32
  }
}

module attributes {stable_mosaic.version = 11 : i64} {
  func.func @_mm_res_kernel(%arg0: i32, %arg1: i32, %arg2: i32, %arg3: memref<64x128xbf16, #tpu.memory_space<vmem>>, %arg4: memref<128x128xbf16, #tpu.memory_space<vmem>>, %arg5: memref<1x128xf32, #tpu.memory_space<vmem>>, %arg6: memref<64x128xf32, #tpu.memory_space<vmem>>, %arg7: memref<64x128xf32, #tpu.memory_space<vmem>>, %arg8: memref<64x128xf32, #tpu.memory_space<vmem>>) attributes {dimension_semantics = [#tpu.dimension_semantics<parallel>, #tpu.dimension_semantics<parallel>, #tpu.dimension_semantics<arbitrary>], iteration_bounds = array<i64: 1, 1, 1>, scalar_prefetch = 0 : i64, scratch_operands = 1 : i64, tpu.core_type = #tpu.core_type<tc>, window_params = [{transform_indices = @transform_0, window_bounds = array<i64: 64, 128>}, {transform_indices = @transform_1, window_bounds = array<i64: 128, 128>}, {transform_indices = @transform_2, window_bounds = array<i64: 1, 128>}, {transform_indices = @transform_3, window_bounds = array<i64: 64, 128>}, {transform_indices = @transform_4, window_bounds = array<i64: 64, 128>}]} {
    %c0_i32 = arith.constant 0 : i32
    %0 = arith.cmpi eq, %arg2, %c0_i32 : i32
    %1 = arith.extui %0 : i1 to i32
    %c0_i32_0 = arith.constant 0 : i32
    %2 = arith.cmpi ne, %1, %c0_i32_0 : i32
    scf.if %2 {
      %cst_10 = arith.constant 0.000000e+00 : f32
      %12 = vector.broadcast %cst_10 : f32 to vector<64x128xf32>
      %c0_11 = arith.constant 0 : index
      %c0_12 = arith.constant 0 : index
      %13 = vector.load %arg8[%c0_11, %c0_12] : memref<64x128xf32, #tpu.memory_space<vmem>>, vector<64x128xf32>
      tpu.vector_store %arg8[%c0_11, %c0_12], %12 {strides = array<i32>} : memref<64x128xf32, #tpu.memory_space<vmem>>, vector<64x128xf32>,
    } else {
    }
    %c0 = arith.constant 0 : index
    %c0_1 = arith.constant 0 : index
    %3 = vector.load %arg8[%c0, %c0_1] : memref<64x128xf32, #tpu.memory_space<vmem>>, vector<64x128xf32>
    %c0_2 = arith.constant 0 : index
    %c0_3 = arith.constant 0 : index
    %4 = vector.load %arg3[%c0_2, %c0_3] : memref<64x128xbf16, #tpu.memory_space<vmem>>, vector<64x128xbf16>
    %c0_4 = arith.constant 0 : index
    %c0_5 = arith.constant 0 : index
    %5 = vector.load %arg4[%c0_4, %c0_5] : memref<128x128xbf16, #tpu.memory_space<vmem>>, vector<128x128xbf16>
    %cst = arith.constant dense<0.000000e+00> : vector<64x128xf32>
    %6 = tpu.matmul %4, %5, %cst {dimension_numbers = #tpu.dot_dimension_numbers<[1], [0], [0], [1], [0, 0, 1, 1], [], []>} : vector<64x128xbf16>, vector<128x128xbf16>, vector<64x128xf32> -> vector<64x128xf32>
    %7 = arith.addf %3, %6 : vector<64x128xf32>
    %c0_6 = arith.constant 0 : index
    %c0_7 = arith.constant 0 : index
    %8 = vector.load %arg8[%c0_6, %c0_7] : memref<64x128xf32, #tpu.memory_space<vmem>>, vector<64x128xf32>
    tpu.vector_store %arg8[%c0_6, %c0_7], %7 {strides = array<i32>} : memref<64x128xf32, #tpu.memory_space<vmem>>, vector<64x128xf32>,
    %c0_i32_8 = arith.constant 0 : i32
    %9 = arith.cmpi eq, %arg2, %c0_i32_8 : i32
    %10 = arith.extui %9 : i1 to i32
    %c0_i32_9 = arith.constant 0 : i32
    %11 = arith.cmpi ne, %10, %c0_i32_9 : i32
    scf.if %11 {
      %c0_10 = arith.constant 0 : index
      %c0_11 = arith.constant 0 : index
      %12 = vector.load %arg8[%c0_10, %c0_11] : memref<64x128xf32, #tpu.memory_space<vmem>>, vector<64x128xf32>
      %c0_12 = arith.constant 0 : index
      %c0_13 = arith.constant 0 : index
      %13 = vector.load %arg5[%c0_12, %c0_13] : memref<1x128xf32, #tpu.memory_space<vmem>>, vector<1x128xf32>
      %14 = vector.broadcast %13 : vector<1x128xf32> to vector<64x128xf32>
      %15 = arith.addf %12, %14 : vector<64x128xf32>
      %c0_14 = arith.constant 0 : index
      %c0_15 = arith.constant 0 : index
      %16 = vector.load %arg6[%c0_14, %c0_15] : memref<64x128xf32, #tpu.memory_space<vmem>>, vector<64x128xf32>
      %17 = arith.addf %15, %16 : vector<64x128xf32>
      %c0_16 = arith.constant 0 : index
      %c0_17 = arith.constant 0 : index
      %18 = vector.load %arg7[%c0_16, %c0_17] : memref<64x128xf32, #tpu.memory_space<vmem>>, vector<64x128xf32>
      tpu.vector_store %arg7[%c0_16, %c0_17], %17 {strides = array<i32>} : memref<64x128xf32, #tpu.memory_space<vmem>>, vector<64x128xf32>,
    } else {
    }
    return
  }
  func.func @transform_0(%arg0: i32, %arg1: i32, %arg2: i32) -> (i32, i32) {
    %c0_i32 = arith.constant 0 : i32
    return %arg0, %arg2 : i32, i32
  }
  func.func @transform_1(%arg0: i32, %arg1: i32, %arg2: i32) -> (i32, i32) {
    %c0_i32 = arith.constant 0 : i32
    return %arg2, %arg1 : i32, i32
  }
  func.func @transform_2(%arg0: i32, %arg1: i32, %arg2: i32) -> (i32, i32) {
    %c0_i32 = arith.constant 0 : i32
    %c0_i32_0 = arith.constant 0 : i32
    return %c0_i32, %arg1 : i32, i32
  }
  func.func @transform_3(%arg0: i32, %arg1: i32, %arg2: i32) -> (i32, i32) {
    %c0_i32 = arith.constant 0 : i32
    return %arg0, %arg1 : i32, i32
  }
  func.func @transform_4(%arg0: i32, %arg1: i32, %arg2: i32) -> (i32, i32) {
    %c0_i32 = arith.constant 0 : i32
    return %arg0, %arg1 : i32, i32
  }
}

module attributes {stable_mosaic.version = 11 : i64} {
  func.func @_mm_kernel(%arg0: i32, %arg1: i32, %arg2: i32, %arg3: memref<64x128xbf16, #tpu.memory_space<vmem>>, %arg4: memref<128x128xbf16, #tpu.memory_space<vmem>>, %arg5: memref<1x128xf32, #tpu.memory_space<vmem>>, %arg6: memref<64x128xf32, #tpu.memory_space<vmem>>, %arg7: memref<64x128xf32, #tpu.memory_space<vmem>>) attributes {dimension_semantics = [#tpu.dimension_semantics<parallel>, #tpu.dimension_semantics<parallel>, #tpu.dimension_semantics<arbitrary>], iteration_bounds = array<i64: 1, 1, 1>, scalar_prefetch = 0 : i64, scratch_operands = 1 : i64, tpu.core_type = #tpu.core_type<tc>, window_params = [{transform_indices = @transform_0, window_bounds = array<i64: 64, 128>}, {transform_indices = @transform_1, window_bounds = array<i64: 128, 128>}, {transform_indices = @transform_2, window_bounds = array<i64: 1, 128>}, {transform_indices = @transform_3, window_bounds = array<i64: 64, 128>}]} {
    %c0_i32 = arith.constant 0 : i32
    %0 = arith.cmpi eq, %arg2, %c0_i32 : i32
    %1 = arith.extui %0 : i1 to i32
    %c0_i32_0 = arith.constant 0 : i32
    %2 = arith.cmpi ne, %1, %c0_i32_0 : i32
    scf.if %2 {
      %cst_10 = arith.constant 0.000000e+00 : f32
      %12 = vector.broadcast %cst_10 : f32 to vector<64x128xf32>
      %c0_11 = arith.constant 0 : index
      %c0_12 = arith.constant 0 : index
      %13 = vector.load %arg7[%c0_11, %c0_12] : memref<64x128xf32, #tpu.memory_space<vmem>>, vector<64x128xf32>
      tpu.vector_store %arg7[%c0_11, %c0_12], %12 {strides = array<i32>} : memref<64x128xf32, #tpu.memory_space<vmem>>, vector<64x128xf32>,
    } else {
    }
    %c0 = arith.constant 0 : index
    %c0_1 = arith.constant 0 : index
    %3 = vector.load %arg7[%c0, %c0_1] : memref<64x128xf32, #tpu.memory_space<vmem>>, vector<64x128xf32>
    %c0_2 = arith.constant 0 : index
    %c0_3 = arith.constant 0 : index
    %4 = vector.load %arg3[%c0_2, %c0_3] : memref<64x128xbf16, #tpu.memory_space<vmem>>, vector<64x128xbf16>
    %c0_4 = arith.constant 0 : index
    %c0_5 = arith.constant 0 : index
    %5 = vector.load %arg4[%c0_4, %c0_5] : memref<128x128xbf16, #tpu.memory_space<vmem>>, vector<128x128xbf16>
    %cst = arith.constant dense<0.000000e+00> : vector<64x128xf32>
    %6 = tpu.matmul %4, %5, %cst {dimension_numbers = #tpu.dot_dimension_numbers<[1], [0], [0], [1], [0, 0, 1, 1], [], []>} : vector<64x128xbf16>, vector<128x128xbf16>, vector<64x128xf32> -> vector<64x128xf32>
    %7 = arith.addf %3, %6 : vector<64x128xf32>
    %c0_6 = arith.constant 0 : index
    %c0_7 = arith.constant 0 : index
    %8 = vector.load %arg7[%c0_6, %c0_7] : memref<64x128xf32, #tpu.memory_space<vmem>>, vector<64x128xf32>
    tpu.vector_store %arg7[%c0_6, %c0_7], %7 {strides = array<i32>} : memref<64x128xf32, #tpu.memory_space<vmem>>, vector<64x128xf32>,
    %c0_i32_8 = arith.constant 0 : i32
    %9 = arith.cmpi eq, %arg2, %c0_i32_8 : i32
    %10 = arith.extui %9 : i1 to i32
    %c0_i32_9 = arith.constant 0 : i32
    %11 = arith.cmpi ne, %10, %c0_i32_9 : i32
    scf.if %11 {
      %c0_10 = arith.constant 0 : index
      %c0_11 = arith.constant 0 : index
      %12 = vector.load %arg7[%c0_10, %c0_11] : memref<64x128xf32, #tpu.memory_space<vmem>>, vector<64x128xf32>
      %c0_12 = arith.constant 0 : index
      %c0_13 = arith.constant 0 : index
      %13 = vector.load %arg5[%c0_12, %c0_13] : memref<1x128xf32, #tpu.memory_space<vmem>>, vector<1x128xf32>
      %14 = vector.broadcast %13 : vector<1x128xf32> to vector<64x128xf32>
      %15 = arith.addf %12, %14 : vector<64x128xf32>
      %c0_14 = arith.constant 0 : index
      %c0_15 = arith.constant 0 : index
      %16 = vector.load %arg6[%c0_14, %c0_15] : memref<64x128xf32, #tpu.memory_space<vmem>>, vector<64x128xf32>
      tpu.vector_store %arg6[%c0_14, %c0_15], %15 {strides = array<i32>} : memref<64x128xf32, #tpu.memory_space<vmem>>, vector<64x128xf32>,
    } else {
    }
    return
  }
  func.func @transform_0(%arg0: i32, %arg1: i32, %arg2: i32) -> (i32, i32) {
    %c0_i32 = arith.constant 0 : i32
    return %arg0, %arg2 : i32, i32
  }
  func.func @transform_1(%arg0: i32, %arg1: i32, %arg2: i32) -> (i32, i32) {
    %c0_i32 = arith.constant 0 : i32
    return %arg2, %arg1 : i32, i32
  }
  func.func @transform_2(%arg0: i32, %arg1: i32, %arg2: i32) -> (i32, i32) {
    %c0_i32 = arith.constant 0 : i32
    %c0_i32_0 = arith.constant 0 : i32
    return %c0_i32, %arg1 : i32, i32
  }
  func.func @transform_3(%arg0: i32, %arg1: i32, %arg2: i32) -> (i32, i32) {
    %c0_i32 = arith.constant 0 : i32
    return %arg0, %arg1 : i32, i32
  }
}

module attributes {stable_mosaic.version = 11 : i64} {
  func.func @_end_conv_kernel(%arg0: i32, %arg1: i32, %arg2: memref<1x1x1x384xf32, #tpu.memory_space<vmem>>, %arg3: memref<1x1x384xf32, #tpu.memory_space<vmem>>, %arg4: memref<3x32x1xf32, #tpu.memory_space<vmem>>, %arg5: memref<32x1xf32, #tpu.memory_space<vmem>>, %arg6: memref<3x32x32xf32, #tpu.memory_space<vmem>>, %arg7: memref<32x1xf32, #tpu.memory_space<vmem>>, %arg8: memref<3x1x32xf32, #tpu.memory_space<vmem>>, %arg9: memref<1x1xf32, #tpu.memory_space<vmem>>, %arg10: memref<1x1x1x128xf32, #tpu.memory_space<vmem>>) attributes {dimension_semantics = [#tpu.dimension_semantics<parallel>, #tpu.dimension_semantics<parallel>], iteration_bounds = array<i64: 2, 1>, scalar_prefetch = 0 : i64, scratch_operands = 0 : i64, tpu.core_type = #tpu.core_type<tc>, window_params = [{transform_indices = @transform_0, window_bounds = array<i64: 1, 1, 1, 384>}, {transform_indices = @transform_1, window_bounds = array<i64: 1, 1, 384>}, {pipeline_mode = #tpu.pipeline_mode<synchronous>, transform_indices = @transform_2, window_bounds = array<i64: 3, 32, 1>}, {pipeline_mode = #tpu.pipeline_mode<synchronous>, transform_indices = @transform_3, window_bounds = array<i64: 32, 1>}, {pipeline_mode = #tpu.pipeline_mode<synchronous>, transform_indices = @transform_4, window_bounds = array<i64: 3, 32, 32>}, {pipeline_mode = #tpu.pipeline_mode<synchronous>, transform_indices = @transform_5, window_bounds = array<i64: 32, 1>}, {pipeline_mode = #tpu.pipeline_mode<synchronous>, transform_indices = @transform_6, window_bounds = array<i64: 3, 1, 32>}, {pipeline_mode = #tpu.pipeline_mode<synchronous>, transform_indices = @transform_7, window_bounds = array<i64: 1, 1>}, {transform_indices = @transform_8, window_bounds = array<i64: 1, 1, 1, 128>}]} {
    %c0 = arith.constant 0 : index
    %c0_0 = arith.constant 0 : index
    %c0_1 = arith.constant 0 : index
    %c0_2 = arith.constant 0 : index
    %0 = vector.load %arg2[%c0, %c0_0, %c0_1, %c0_2] : memref<1x1x1x384xf32, #tpu.memory_space<vmem>>, vector<1x1x1x384xf32>
    %1 = vector.shape_cast %0 : vector<1x1x1x384xf32> to vector<1x384xf32>
    %c0_3 = arith.constant 0 : index
    %c0_4 = arith.constant 0 : index
    %c0_5 = arith.constant 0 : index
    %2 = vector.load %arg3[%c0_3, %c0_4, %c0_5] : memref<1x1x384xf32, #tpu.memory_space<vmem>>, vector<1x1x384xf32>
    %3 = vector.shape_cast %2 : vector<1x1x384xf32> to vector<1x384xf32>
    %4 = arith.mulf %1, %3 : vector<1x384xf32>
    %5 = vector.extract_strided_slice %4 {offsets = [0, 383], sizes = [1, 1], strides = [1, 1]} : vector<1x384xf32> to vector<1x1xf32>
    %6 = vector.extract_strided_slice %4 {offsets = [0, 0], sizes = [1, 383], strides = [1, 1]} : vector<1x384xf32> to vector<1x383xf32>
    %7 = tpu.concatenate %5, %6 in 1 : vector<1x1xf32>, vector<1x383xf32> -> vector<1x384xf32>
    %8 = vector.extract_strided_slice %4 {offsets = [0, 1], sizes = [1, 383], strides = [1, 1]} : vector<1x384xf32> to vector<1x383xf32>
    %9 = vector.extract_strided_slice %4 {offsets = [0, 0], sizes = [1, 1], strides = [1, 1]} : vector<1x384xf32> to vector<1x1xf32>
    %10 = tpu.concatenate %8, %9 in 1 : vector<1x383xf32>, vector<1x1xf32> -> vector<1x384xf32>
    %c0_6 = arith.constant 0 : index
    %c0_7 = arith.constant 0 : index
    %c0_8 = arith.constant 0 : index
    %11 = vector.load %arg4[%c0_6, %c0_7, %c0_8] : memref<3x32x1xf32, #tpu.memory_space<vmem>>, vector<1x32x1xf32>
    %12 = vector.shape_cast %11 : vector<1x32x1xf32> to vector<32x1xf32>
    %13 = vector.broadcast %12 : vector<32x1xf32> to vector<32x384xf32>
    %14 = vector.broadcast %7 : vector<1x384xf32> to vector<32x384xf32>
    %15 = arith.mulf %13, %14 : vector<32x384xf32>
    %c1 = arith.constant 1 : index
    %c0_9 = arith.constant 0 : index
    %c0_10 = arith.constant 0 : index
    %16 = vector.load %arg4[%c1, %c0_9, %c0_10] : memref<3x32x1xf32, #tpu.memory_space<vmem>>, vector<1x32x1xf32>
    %17 = vector.shape_cast %16 : vector<1x32x1xf32> to vector<32x1xf32>
    %18 = vector.broadcast %17 : vector<32x1xf32> to vector<32x384xf32>
    %19 = vector.broadcast %4 : vector<1x384xf32> to vector<32x384xf32>
    %20 = arith.mulf %18, %19 : vector<32x384xf32>
    %21 = arith.addf %15, %20 : vector<32x384xf32>
    %c2 = arith.constant 2 : index
    %c0_11 = arith.constant 0 : index
    %c0_12 = arith.constant 0 : index
    %22 = vector.load %arg4[%c2, %c0_11, %c0_12] : memref<3x32x1xf32, #tpu.memory_space<vmem>>, vector<1x32x1xf32>
    %23 = vector.shape_cast %22 : vector<1x32x1xf32> to vector<32x1xf32>
    %24 = vector.broadcast %23 : vector<32x1xf32> to vector<32x384xf32>
    %25 = vector.broadcast %10 : vector<1x384xf32> to vector<32x384xf32>
    %26 = arith.mulf %24, %25 : vector<32x384xf32>
    %27 = arith.addf %21, %26 : vector<32x384xf32>
    %c0_13 = arith.constant 0 : index
    %c0_14 = arith.constant 0 : index
    %28 = vector.load %arg5[%c0_13, %c0_14] : memref<32x1xf32, #tpu.memory_space<vmem>>, vector<32x1xf32>
    %29 = vector.broadcast %28 : vector<32x1xf32> to vector<32x384xf32>
    %30 = arith.addf %27, %29 : vector<32x384xf32>
    %cst = arith.constant 0.000000e+00 : f32
    %31 = vector.broadcast %cst : f32 to vector<32x384xf32>
    %32 = arith.cmpf oge, %30, %31 : vector<32x384xf32>
    %cst_15 = arith.constant 2.000000e-01 : f32
    %33 = vector.broadcast %cst_15 : f32 to vector<32x384xf32>
    %34 = arith.mulf %33, %30 : vector<32x384xf32>
    %35 = arith.select %32, %30, %34 : vector<32x384xi1>, vector<32x384xf32>
    %36 = vector.extract_strided_slice %35 {offsets = [0, 383], sizes = [32, 1], strides = [1, 1]} : vector<32x384xf32> to vector<32x1xf32>
    %37 = vector.extract_strided_slice %35 {offsets = [0, 0], sizes = [32, 383], strides = [1, 1]} : vector<32x384xf32> to vector<32x383xf32>
    %38 = tpu.concatenate %36, %37 in 1 : vector<32x1xf32>, vector<32x383xf32> -> vector<32x384xf32>
    %39 = vector.extract_strided_slice %35 {offsets = [0, 1], sizes = [32, 383], strides = [1, 1]} : vector<32x384xf32> to vector<32x383xf32>
    %40 = vector.extract_strided_slice %35 {offsets = [0, 0], sizes = [32, 1], strides = [1, 1]} : vector<32x384xf32> to vector<32x1xf32>
    %41 = tpu.concatenate %39, %40 in 1 : vector<32x383xf32>, vector<32x1xf32> -> vector<32x384xf32>
    %c0_16 = arith.constant 0 : index
    %c0_17 = arith.constant 0 : index
    %c0_18 = arith.constant 0 : index
    %42 = vector.load %arg6[%c0_16, %c0_17, %c0_18] : memref<3x32x32xf32, #tpu.memory_space<vmem>>, vector<1x32x32xf32>
    %43 = vector.shape_cast %42 : vector<1x32x32xf32> to vector<32x32xf32>
    %cst_19 = arith.constant dense<0.000000e+00> : vector<32x384xf32>
    %44 = tpu.matmul %43, %38, %cst_19 {dimension_numbers = #tpu.dot_dimension_numbers<[1], [0], [0], [1], [0, 0, 1, 1], [], []>} : vector<32x32xf32>, vector<32x384xf32>, vector<32x384xf32> -> vector<32x384xf32>
    %c1_20 = arith.constant 1 : index
    %c0_21 = arith.constant 0 : index
    %c0_22 = arith.constant 0 : index
    %45 = vector.load %arg6[%c1_20, %c0_21, %c0_22] : memref<3x32x32xf32, #tpu.memory_space<vmem>>, vector<1x32x32xf32>
    %46 = vector.shape_cast %45 : vector<1x32x32xf32> to vector<32x32xf32>
    %cst_23 = arith.constant dense<0.000000e+00> : vector<32x384xf32>
    %47 = tpu.matmul %46, %35, %cst_23 {dimension_numbers = #tpu.dot_dimension_numbers<[1], [0], [0], [1], [0, 0, 1, 1], [], []>} : vector<32x32xf32>, vector<32x384xf32>, vector<32x384xf32> -> vector<32x384xf32>
    %48 = arith.addf %44, %47 : vector<32x384xf32>
    %c2_24 = arith.constant 2 : index
    %c0_25 = arith.constant 0 : index
    %c0_26 = arith.constant 0 : index
    %49 = vector.load %arg6[%c2_24, %c0_25, %c0_26] : memref<3x32x32xf32, #tpu.memory_space<vmem>>, vector<1x32x32xf32>
    %50 = vector.shape_cast %49 : vector<1x32x32xf32> to vector<32x32xf32>
    %cst_27 = arith.constant dense<0.000000e+00> : vector<32x384xf32>
    %51 = tpu.matmul %50, %41, %cst_27 {dimension_numbers = #tpu.dot_dimension_numbers<[1], [0], [0], [1], [0, 0, 1, 1], [], []>} : vector<32x32xf32>, vector<32x384xf32>, vector<32x384xf32> -> vector<32x384xf32>
    %52 = arith.addf %48, %51 : vector<32x384xf32>
    %c0_28 = arith.constant 0 : index
    %c0_29 = arith.constant 0 : index
    %53 = vector.load %arg7[%c0_28, %c0_29] : memref<32x1xf32, #tpu.memory_space<vmem>>, vector<32x1xf32>
    %54 = vector.broadcast %53 : vector<32x1xf32> to vector<32x384xf32>
    %55 = arith.addf %52, %54 : vector<32x384xf32>
    %cst_30 = arith.constant 0.000000e+00 : f32
    %56 = vector.broadcast %cst_30 : f32 to vector<32x384xf32>
    %57 = arith.cmpf oge, %55, %56 : vector<32x384xf32>
    %cst_31 = arith.constant 2.000000e-01 : f32
    %58 = vector.broadcast %cst_31 : f32 to vector<32x384xf32>
    %59 = arith.mulf %58, %55 : vector<32x384xf32>
    %60 = arith.select %57, %55, %59 : vector<32x384xi1>, vector<32x384xf32>
    %61 = vector.extract_strided_slice %60 {offsets = [0, 383], sizes = [32, 1], strides = [1, 1]} : vector<32x384xf32> to vector<32x1xf32>
    %62 = vector.extract_strided_slice %60 {offsets = [0, 0], sizes = [32, 383], strides = [1, 1]} : vector<32x384xf32> to vector<32x383xf32>
    %63 = tpu.concatenate %61, %62 in 1 : vector<32x1xf32>, vector<32x383xf32> -> vector<32x384xf32>
    %64 = vector.extract_strided_slice %60 {offsets = [0, 1], sizes = [32, 383], strides = [1, 1]} : vector<32x384xf32> to vector<32x383xf32>
    %65 = vector.extract_strided_slice %60 {offsets = [0, 0], sizes = [32, 1], strides = [1, 1]} : vector<32x384xf32> to vector<32x1xf32>
    %66 = tpu.concatenate %64, %65 in 1 : vector<32x383xf32>, vector<32x1xf32> -> vector<32x384xf32>
    %c0_32 = arith.constant 0 : index
    %c0_33 = arith.constant 0 : index
    %c0_34 = arith.constant 0 : index
    %67 = vector.load %arg8[%c0_32, %c0_33, %c0_34] : memref<3x1x32xf32, #tpu.memory_space<vmem>>, vector<1x1x32xf32>
    %68 = vector.shape_cast %67 : vector<1x1x32xf32> to vector<1x32xf32>
    %cst_35 = arith.constant dense<0.000000e+00> : vector<1x384xf32>
    %69 = tpu.matmul %68, %63, %cst_35 {dimension_numbers = #tpu.dot_dimension_numbers<[1], [0], [0], [1], [0, 0, 1, 1], [], []>} : vector<1x32xf32>, vector<32x384xf32>, vector<1x384xf32> -> vector<1x384xf32>
    %c1_36 = arith.constant 1 : index
    %c0_37 = arith.constant 0 : index
    %c0_38 = arith.constant 0 : index
    %70 = vector.load %arg8[%c1_36, %c0_37, %c0_38] : memref<3x1x32xf32, #tpu.memory_space<vmem>>, vector<1x1x32xf32>
    %71 = vector.shape_cast %70 : vector<1x1x32xf32> to vector<1x32xf32>
    %cst_39 = arith.constant dense<0.000000e+00> : vector<1x384xf32>
    %72 = tpu.matmul %71, %60, %cst_39 {dimension_numbers = #tpu.dot_dimension_numbers<[1], [0], [0], [1], [0, 0, 1, 1], [], []>} : vector<1x32xf32>, vector<32x384xf32>, vector<1x384xf32> -> vector<1x384xf32>
    %73 = arith.addf %69, %72 : vector<1x384xf32>
    %c2_40 = arith.constant 2 : index
    %c0_41 = arith.constant 0 : index
    %c0_42 = arith.constant 0 : index
    %74 = vector.load %arg8[%c2_40, %c0_41, %c0_42] : memref<3x1x32xf32, #tpu.memory_space<vmem>>, vector<1x1x32xf32>
    %75 = vector.shape_cast %74 : vector<1x1x32xf32> to vector<1x32xf32>
    %cst_43 = arith.constant dense<0.000000e+00> : vector<1x384xf32>
    %76 = tpu.matmul %75, %66, %cst_43 {dimension_numbers = #tpu.dot_dimension_numbers<[1], [0], [0], [1], [0, 0, 1, 1], [], []>} : vector<1x32xf32>, vector<32x384xf32>, vector<1x384xf32> -> vector<1x384xf32>
    %77 = arith.addf %73, %76 : vector<1x384xf32>
    %c0_44 = arith.constant 0 : index
    %c0_45 = arith.constant 0 : index
    %78 = vector.load %arg9[%c0_44, %c0_45] : memref<1x1xf32, #tpu.memory_space<vmem>>, vector<1x1xf32>
    %79 = vector.broadcast %78 : vector<1x1xf32> to vector<1x384xf32>
    %80 = arith.addf %77, %79 : vector<1x384xf32>
    %81 = vector.extract_strided_slice %80 {offsets = [0, 128], sizes = [1, 128], strides = [1, 1]} : vector<1x384xf32> to vector<1x128xf32>
    %82 = vector.shape_cast %81 : vector<1x128xf32> to vector<1x1x1x128xf32>
    %c0_46 = arith.constant 0 : index
    %c0_47 = arith.constant 0 : index
    %c0_48 = arith.constant 0 : index
    %c0_49 = arith.constant 0 : index
    %83 = vector.load %arg10[%c0_46, %c0_47, %c0_48, %c0_49] : memref<1x1x1x128xf32, #tpu.memory_space<vmem>>, vector<1x1x1x128xf32>
    tpu.vector_store %arg10[%c0_46, %c0_47, %c0_48, %c0_49], %82 {strides = array<i32>} : memref<1x1x1x128xf32, #tpu.memory_space<vmem>>, vector<1x1x1x128xf32>,
    return
  }
  func.func @transform_0(%arg0: i32, %arg1: i32) -> (i32, i32, i32, i32) {
    %c0_i32 = arith.constant 0 : i32
    %c0_i32_0 = arith.constant 0 : i32
    %c0_i32_1 = arith.constant 0 : i32
    return %arg0, %arg1, %c0_i32, %c0_i32_0 : i32, i32, i32, i32
  }
  func.func @transform_1(%arg0: i32, %arg1: i32) -> (i32, i32, i32) {
    %c0_i32 = arith.constant 0 : i32
    %c0_i32_0 = arith.constant 0 : i32
    %c0_i32_1 = arith.constant 0 : i32
    return %arg1, %c0_i32, %c0_i32_0 : i32, i32, i32
  }
  func.func @transform_2(%arg0: i32, %arg1: i32) -> (i32, i32, i32) {
    %c0_i32 = arith.constant 0 : i32
    %c0_i32_0 = arith.constant 0 : i32
    %c0_i32_1 = arith.constant 0 : i32
    %c0_i32_2 = arith.constant 0 : i32
    return %c0_i32, %c0_i32_0, %c0_i32_1 : i32, i32, i32
  }
  func.func @transform_3(%arg0: i32, %arg1: i32) -> (i32, i32) {
    %c0_i32 = arith.constant 0 : i32
    %c0_i32_0 = arith.constant 0 : i32
    %c0_i32_1 = arith.constant 0 : i32
    return %c0_i32, %c0_i32_0 : i32, i32
  }
  func.func @transform_4(%arg0: i32, %arg1: i32) -> (i32, i32, i32) {
    %c0_i32 = arith.constant 0 : i32
    %c0_i32_0 = arith.constant 0 : i32
    %c0_i32_1 = arith.constant 0 : i32
    %c0_i32_2 = arith.constant 0 : i32
    return %c0_i32, %c0_i32_0, %c0_i32_1 : i32, i32, i32
  }
  func.func @transform_5(%arg0: i32, %arg1: i32) -> (i32, i32) {
    %c0_i32 = arith.constant 0 : i32
    %c0_i32_0 = arith.constant 0 : i32
    %c0_i32_1 = arith.constant 0 : i32
    return %c0_i32, %c0_i32_0 : i32, i32
  }
  func.func @transform_6(%arg0: i32, %arg1: i32) -> (i32, i32, i32) {
    %c0_i32 = arith.constant 0 : i32
    %c0_i32_0 = arith.constant 0 : i32
    %c0_i32_1 = arith.constant 0 : i32
    %c0_i32_2 = arith.constant 0 : i32
    return %c0_i32, %c0_i32_0, %c0_i32_1 : i32, i32, i32
  }
  func.func @transform_7(%arg0: i32, %arg1: i32) -> (i32, i32) {
    %c0_i32 = arith.constant 0 : i32
    %c0_i32_0 = arith.constant 0 : i32
    %c0_i32_1 = arith.constant 0 : i32
    return %c0_i32, %c0_i32_0 : i32, i32
  }
  func.func @transform_8(%arg0: i32, %arg1: i32) -> (i32, i32, i32, i32) {
    %c0_i32 = arith.constant 0 : i32
    %c0_i32_0 = arith.constant 0 : i32
    %c0_i32_1 = arith.constant 0 : i32
    return %arg0, %arg1, %c0_i32, %c0_i32_0 : i32, i32, i32, i32
  }
}

</mosaic_0001>

<bundles_post_ra>
// kernel: _lambda_.12
= control target key start
LH: loop header
LB: loop body
LE: loop exit
PB: predicated region body
PF: predicated region fallthrough
CT: control target
= control target key end

     0   :  { %s253_s1 = inlined_call_operand.vmem [shape: bf16[128,128], index: 1, kind: input, shape index: {}]   ;;  %s254_s2 = inlined_call_operand.vmem [shape: f32[1,128], index: 2, kind: input, shape index: {}]   ;;  %s255_s0 = inlined_call_operand.vmem [shape: bf16[16,128], index: 0, kind: input, shape index: {}]   ;;  %s256_s3 = inlined_call_operand.vmem [shape: f32[16,128], index: 3, kind: output, shape index: {}]  }
   0x1   :  { %v191_v0 = vld [vmem:[%s253_s1 + $0x38] sm:$0xff]  ;;  %v190_v1 = vld [vmem:[%s253_s1 + $0x30] sm:$0xff]  ;;  %v189_v2 = vld [vmem:[%s253_s1 + $0x28] sm:$0xff] }
   0x2   :  { %94 = vmatpush.bf16.msra.mxu0 %v191_v0  ;;  %v188_v3 = vld [vmem:[%s253_s1 + $0x20] sm:$0xff]  ;;  %v187_v4 = vld [vmem:[%s253_s1 + $0x18] sm:$0xff]  ;;  %v186_v5 = vld [vmem:[%s253_s1 + $0x10] sm:$0xff] }
   0x3   :  { %v185_v6 = vld [vmem:[%s253_s1 + $0x8] sm:$0xff]  ;;  %v184_v7 = vld [vmem:[%s253_s1] sm:$0xff] }
   0x4   :  { %v183_v8 = vld [vmem:[%s255_s0] sm:$0xff] }
   0x5   :  { %v192_v9 = vld [vmem:[%s254_s2] ss:$0 sm:$0xff] }
   0x6   :  { %95 = vmatpush.bf16.msra.mxu0 %v190_v1 }
   0xa   :  { %96 = vmatpush.bf16.msra.mxu0 %v189_v2 }
   0xe   :  { %97 = vmatpush.bf16.msra.mxu0 %v188_v3 }
  0x12   :  { %98 = vmatpush.bf16.msra.mxu0 %v187_v4 }
  0x16   :  { %99 = vmatpush.bf16.msra.mxu0 %v186_v5 }
  0x1a   :  { %100 = vmatpush.bf16.msra.mxu0 %v185_v6 }
  0x1e   :  { %101 = vmatpush.bf16.msra.mxu0 %v184_v7 }
  0x21   :  { %102 = vmatmul.bf16.vlgmr.msra.gmra.mxu0 %v183_v8 }
  0x9e   :  { %v103_v10 = vpop.f32.mrf.mxu0 }
  0x9f   :  { %v121_v11 = vadd.f32 %v192_v9, %v103_v10 }
  0xa1   :  { %v125_v12 = vmul.f32 0.044715, %v121_v11  ;;  %v123_v25 = vmul.f32 0.5, %v121_v11 }
  0xa3   :  { %v127_v13 = vmul.f32 %v125_v12, %v121_v11 }
  0xa5   :  { %v129_v14 = vmul.f32 %v127_v13, %v121_v11 }
  0xa6   :  { %v105_v15 = vpop.f32.mrf.mxu0 }
  0xa7   :  { %v131_v16 = vadd.f32 %v129_v14, %v121_v11  ;;  %v122_v17 = vadd.f32 %v192_v9, %v105_v15 }
  0xa9   :  { %v133_v18 = vmul.f32 0.7978846, %v131_v16  ;;  %v126_v19 = vmul.f32 0.044715, %v122_v17  ;;  %v124_v29 = vmul.f32 0.5, %v122_v17 }
  0xab   :  { %193 = vtanh.f32 %v133_v18  ;;  %v128_v20 = vmul.f32 %v126_v19, %v122_v17 }
  0xad   :  { %v130_v21 = vmul.f32 %v128_v20, %v122_v17 }
  0xaf   :  { %v132_v22 = vadd.f32 %v130_v21, %v122_v17 }
  0xb1   :  { %v194_v23 = vpop.eup %193  ;;  %v134_v24 = vmul.f32 0.7978846, %v132_v22 }
  0xb2   :  { %v137_v26 = vadd.f32 1.0, %v194_v23 }
  0xb3   :  { %195 = vtanh.f32 %v134_v24 }
  0xb4   :  { %v139_v27 = vmul.f32 %v137_v26, %v123_v25 }
  0xb6   :  { %141 = vst [vmem:[%s256_s3] sm:$0xff] %v139_v27 }
  0xb9   :  { %v196_v28 = vpop.eup %195 }
  0xba   :  { %v138_v30 = vadd.f32 1.0, %v196_v28 }
  0xbc   :  { %v140_v31 = vmul.f32 %v138_v30, %v124_v29 }
  0xbe   :  { %142 = vst [vmem:[%s256_s3 + $0x8] sm:$0xff] %v140_v31 }

// kernel: _lambda_.17
= control target key start
LH: loop header
LB: loop body
LE: loop exit
PB: predicated region body
PF: predicated region fallthrough
CT: control target
= control target key end

     0   :  { %s426_s1 = inlined_call_operand.vmem [shape: bf16[128,128], index: 1, kind: input, shape index: {}]   ;;  %s427_s2 = inlined_call_operand.vmem [shape: f32[1,128], index: 2, kind: input, shape index: {}]   ;;  %s428_s0 = inlined_call_operand.vmem [shape: bf16[64,128], index: 0, kind: input, shape index: {}]   ;;  %s429_s3 = inlined_call_operand.vmem [shape: f32[64,128], index: 3, kind: input, shape index: {}]   ;;  %s430_s4 = inlined_call_operand.vmem [shape: f32[64,128], index: 4, kind: output, shape index: {}]  }
   0x1   :  { %v288_v0 = vld [vmem:[%s426_s1 + $0x38] sm:$0xff]  ;;  %v287_v1 = vld [vmem:[%s426_s1 + $0x30] sm:$0xff]  ;;  %v286_v2 = vld [vmem:[%s426_s1 + $0x28] sm:$0xff] }
   0x2   :  { %133 = vmatpush.bf16.msra.mxu0 %v288_v0  ;;  %289 = vmatpush.bf16.msra.mxu1 %v288_v0  ;;  %v285_v3 = vld [vmem:[%s426_s1 + $0x20] sm:$0xff]  ;;  %v284_v4 = vld [vmem:[%s426_s1 + $0x18] sm:$0xff]  ;;  %v283_v5 = vld [vmem:[%s426_s1 + $0x10] sm:$0xff] }
   0x3   :  { %290 = vmatpush.bf16.msra.mxu2 %v288_v0  ;;  %291 = vmatpush.bf16.msra.mxu3 %v288_v0  ;;  %v282_v6 = vld [vmem:[%s426_s1 + $0x8] sm:$0xff]  ;;  %v281_v7 = vld [vmem:[%s426_s1] sm:$0xff]  ;;  %v279_v10 = vld [vmem:[%s428_s0 + $0x10] sm:$0xff] }
   0x4   :  { %v277_v8 = vld [vmem:[%s428_s0] sm:$0xff]  ;;  %v278_v9 = vld [vmem:[%s428_s0 + $0x8] sm:$0xff]  ;;  %v280_v11 = vld [vmem:[%s428_s0 + $0x18] sm:$0xff] }
   0x5   :  { %v313_v12 = vld [vmem:[%s427_s2] ss:$0 sm:$0xff]  ;;  %v203_v16 = vld [vmem:[%s429_s3 + $0x10] sm:$0xff]  ;;  %v202_v28 = vld [vmem:[%s429_s3 + $0x8] sm:$0xff] }
   0x6   :  { %134 = vmatpush.bf16.msra.mxu0 %v287_v1  ;;  %292 = vmatpush.bf16.msra.mxu1 %v287_v1  ;;  %v201_v14 = vld [vmem:[%s429_s3] sm:$0xff]  ;;  %v207_v24 = vld [vmem:[%s429_s3 + $0x30] sm:$0xff]  ;;  %v204_v30 = vld [vmem:[%s429_s3 + $0x18] sm:$0xff] }
   0x7   :  { %293 = vmatpush.bf16.msra.mxu2 %v287_v1  ;;  %294 = vmatpush.bf16.msra.mxu3 %v287_v1  ;;  %v205_v22 = vld [vmem:[%s429_s3 + $0x20] sm:$0xff]  ;;  %v206_v38 = vld [vmem:[%s429_s3 + $0x28] sm:$0xff]  ;;  %v208_v40 = vld [vmem:[%s429_s3 + $0x38] sm:$0xff] }
   0xa   :  { %135 = vmatpush.bf16.msra.mxu0 %v286_v2  ;;  %295 = vmatpush.bf16.msra.mxu1 %v286_v2 }
   0xb   :  { %296 = vmatpush.bf16.msra.mxu2 %v286_v2  ;;  %297 = vmatpush.bf16.msra.mxu3 %v286_v2 }
   0xe   :  { %136 = vmatpush.bf16.msra.mxu0 %v285_v3  ;;  %298 = vmatpush.bf16.msra.mxu1 %v285_v3 }
   0xf   :  { %299 = vmatpush.bf16.msra.mxu2 %v285_v3  ;;  %300 = vmatpush.bf16.msra.mxu3 %v285_v3 }
  0x12   :  { %137 = vmatpush.bf16.msra.mxu0 %v284_v4  ;;  %301 = vmatpush.bf16.msra.mxu1 %v284_v4 }
  0x13   :  { %302 = vmatpush.bf16.msra.mxu2 %v284_v4  ;;  %303 = vmatpush.bf16.msra.mxu3 %v284_v4 }
  0x16   :  { %138 = vmatpush.bf16.msra.mxu0 %v283_v5  ;;  %304 = vmatpush.bf16.msra.mxu1 %v283_v5 }
  0x17   :  { %305 = vmatpush.bf16.msra.mxu2 %v283_v5  ;;  %306 = vmatpush.bf16.msra.mxu3 %v283_v5 }
  0x1a   :  { %139 = vmatpush.bf16.msra.mxu0 %v282_v6  ;;  %307 = vmatpush.bf16.msra.mxu1 %v282_v6 }
  0x1b   :  { %308 = vmatpush.bf16.msra.mxu2 %v282_v6  ;;  %309 = vmatpush.bf16.msra.mxu3 %v282_v6 }
  0x1e   :  { %140 = vmatpush.bf16.msra.mxu0 %v281_v7  ;;  %310 = vmatpush.bf16.msra.mxu1 %v281_v7 }
  0x1f   :  { %311 = vmatpush.bf16.msra.mxu2 %v281_v7  ;;  %312 = vmatpush.bf16.msra.mxu3 %v281_v7 }
  0x21   :  { %141 = vmatmul.bf16.vlgmr.msra.gmra.mxu0 %v277_v8  ;;  %146 = vmatmul.bf16.vlgmr.msra.gmra.mxu1 %v278_v9 }
  0x22   :  { %151 = vmatmul.bf16.vlgmr.msra.gmra.mxu2 %v279_v10  ;;  %156 = vmatmul.bf16.vlgmr.msra.gmra.mxu3 %v280_v11 }
  0x9e   :  { %v142_v13 = vpop.f32.mrf.mxu0  ;;  %v147_v15 = vpop.f32.mrf.mxu1 }
  0x9f   :  { %v193_v17 = vadd.f32 %v313_v12, %v142_v13  ;;  %v195_v18 = vadd.f32 %v313_v12, %v147_v15 }
  0xa1   :  { %v209_v19 = vadd.f32 %v201_v14, %v193_v17  ;;  %v211_v20 = vadd.f32 %v203_v16, %v195_v18 }
  0xa3   :  { %217 = vst [vmem:[%s430_s4] sm:$0xff] %v209_v19 }
  0xa4   :  { %219 = vst [vmem:[%s430_s4 + $0x10] sm:$0xff] %v211_v20 }
  0xa5   :  { %v152_v21 = vpop.f32.mrf.mxu2  ;;  %v157_v23 = vpop.f32.mrf.mxu3 }
  0xa6   :  { %v197_v25 = vadd.f32 %v313_v12, %v152_v21  ;;  %v199_v26 = vadd.f32 %v313_v12, %v157_v23  ;;  %v144_v27 = vpop.f32.mrf.mxu0  ;;  %v149_v29 = vpop.f32.mrf.mxu1 }
  0xa7   :  { %v194_v31 = vadd.f32 %v313_v12, %v144_v27  ;;  %v196_v32 = vadd.f32 %v313_v12, %v149_v29 }
  0xa8   :  { %v213_v33 = vadd.f32 %v205_v22, %v197_v25  ;;  %v215_v34 = vadd.f32 %v207_v24, %v199_v26 }
  0xa9   :  { %v210_v35 = vadd.f32 %v202_v28, %v194_v31  ;;  %v212_v36 = vadd.f32 %v204_v30, %v196_v32 }
  0xaa   :  { %221 = vst [vmem:[%s430_s4 + $0x20] sm:$0xff] %v213_v33 }
  0xab   :  { %223 = vst [vmem:[%s430_s4 + $0x30] sm:$0xff] %v215_v34 }
  0xac   :  { %218 = vst [vmem:[%s430_s4 + $0x8] sm:$0xff] %v210_v35 }
  0xad   :  { %220 = vst [vmem:[%s430_s4 + $0x18] sm:$0xff] %v212_v36  ;;  %v154_v37 = vpop.f32.mrf.mxu2  ;;  %v159_v39 = vpop.f32.mrf.mxu3 }
  0xae   :  { %v198_v41 = vadd.f32 %v313_v12, %v154_v37  ;;  %v200_v42 = vadd.f32 %v313_v12, %v159_v39 }
  0xb0   :  { %v214_v43 = vadd.f32 %v206_v38, %v198_v41  ;;  %v216_v44 = vadd.f32 %v208_v40, %v200_v42 }
  0xb2   :  { %222 = vst [vmem:[%s430_s4 + $0x28] sm:$0xff] %v214_v43 }
  0xb3   :  { %224 = vst [vmem:[%s430_s4 + $0x38] sm:$0xff] %v216_v44 }

// kernel: _lambda_.16
= control target key start
LH: loop header
LB: loop body
LE: loop exit
PB: predicated region body
PF: predicated region fallthrough
CT: control target
= control target key end

     0   :  { %s487_s1 = inlined_call_operand.vmem [shape: bf16[128,128], index: 1, kind: input, shape index: {}]   ;;  %s488_s2 = inlined_call_operand.vmem [shape: f32[1,128], index: 2, kind: input, shape index: {}]   ;;  %s489_s0 = inlined_call_operand.vmem [shape: bf16[64,128], index: 0, kind: input, shape index: {}]   ;;  %s490_s3 = inlined_call_operand.vmem [shape: f32[64,128], index: 3, kind: output, shape index: {}]  }
   0x1   :  { %v341_v0 = vld [vmem:[%s487_s1 + $0x38] sm:$0xff]  ;;  %v340_v1 = vld [vmem:[%s487_s1 + $0x30] sm:$0xff]  ;;  %v339_v2 = vld [vmem:[%s487_s1 + $0x28] sm:$0xff] }
   0x2   :  { %130 = vmatpush.bf16.msra.mxu0 %v341_v0  ;;  %342 = vmatpush.bf16.msra.mxu1 %v341_v0  ;;  %v338_v3 = vld [vmem:[%s487_s1 + $0x20] sm:$0xff]  ;;  %v337_v4 = vld [vmem:[%s487_s1 + $0x18] sm:$0xff]  ;;  %v336_v5 = vld [vmem:[%s487_s1 + $0x10] sm:$0xff] }
   0x3   :  { %343 = vmatpush.bf16.msra.mxu2 %v341_v0  ;;  %344 = vmatpush.bf16.msra.mxu3 %v341_v0  ;;  %v335_v6 = vld [vmem:[%s487_s1 + $0x8] sm:$0xff]  ;;  %v334_v7 = vld [vmem:[%s487_s1] sm:$0xff]  ;;  %v332_v10 = vld [vmem:[%s489_s0 + $0x10] sm:$0xff] }
   0x4   :  { %v330_v8 = vld [vmem:[%s489_s0] sm:$0xff]  ;;  %v331_v9 = vld [vmem:[%s489_s0 + $0x8] sm:$0xff]  ;;  %v333_v11 = vld [vmem:[%s489_s0 + $0x18] sm:$0xff] }
   0x5   :  { %v366_v12 = vld [vmem:[%s488_s2] ss:$0 sm:$0xff] }
   0x6   :  { %131 = vmatpush.bf16.msra.mxu0 %v340_v1  ;;  %345 = vmatpush.bf16.msra.mxu1 %v340_v1 }
   0x7   :  { %346 = vmatpush.bf16.msra.mxu2 %v340_v1  ;;  %347 = vmatpush.bf16.msra.mxu3 %v340_v1 }
   0xa   :  { %132 = vmatpush.bf16.msra.mxu0 %v339_v2  ;;  %348 = vmatpush.bf16.msra.mxu1 %v339_v2 }
   0xb   :  { %349 = vmatpush.bf16.msra.mxu2 %v339_v2  ;;  %350 = vmatpush.bf16.msra.mxu3 %v339_v2 }
   0xe   :  { %133 = vmatpush.bf16.msra.mxu0 %v338_v3  ;;  %351 = vmatpush.bf16.msra.mxu1 %v338_v3 }
   0xf   :  { %352 = vmatpush.bf16.msra.mxu2 %v338_v3  ;;  %353 = vmatpush.bf16.msra.mxu3 %v338_v3 }
  0x12   :  { %134 = vmatpush.bf16.msra.mxu0 %v337_v4  ;;  %354 = vmatpush.bf16.msra.mxu1 %v337_v4 }
  0x13   :  { %355 = vmatpush.bf16.msra.mxu2 %v337_v4  ;;  %356 = vmatpush.bf16.msra.mxu3 %v337_v4 }
  0x16   :  { %135 = vmatpush.bf16.msra.mxu0 %v336_v5  ;;  %357 = vmatpush.bf16.msra.mxu1 %v336_v5 }
  0x17   :  { %358 = vmatpush.bf16.msra.mxu2 %v336_v5  ;;  %359 = vmatpush.bf16.msra.mxu3 %v336_v5 }
  0x1a   :  { %136 = vmatpush.bf16.msra.mxu0 %v335_v6  ;;  %360 = vmatpush.bf16.msra.mxu1 %v335_v6 }
  0x1b   :  { %361 = vmatpush.bf16.msra.mxu2 %v335_v6  ;;  %362 = vmatpush.bf16.msra.mxu3 %v335_v6 }
  0x1e   :  { %137 = vmatpush.bf16.msra.mxu0 %v334_v7  ;;  %363 = vmatpush.bf16.msra.mxu1 %v334_v7 }
  0x1f   :  { %364 = vmatpush.bf16.msra.mxu2 %v334_v7  ;;  %365 = vmatpush.bf16.msra.mxu3 %v334_v7 }
  0x21   :  { %138 = vmatmul.bf16.vlgmr.msra.gmra.mxu0 %v330_v8  ;;  %143 = vmatmul.bf16.vlgmr.msra.gmra.mxu1 %v331_v9 }
  0x22   :  { %148 = vmatmul.bf16.vlgmr.msra.gmra.mxu2 %v332_v10  ;;  %153 = vmatmul.bf16.vlgmr.msra.gmra.mxu3 %v333_v11 }
  0x9e   :  { %v139_v13 = vpop.f32.mrf.mxu0  ;;  %v144_v14 = vpop.f32.mrf.mxu1 }
  0x9f   :  { %v190_v15 = vadd.f32 %v366_v12, %v139_v13  ;;  %v192_v16 = vadd.f32 %v366_v12, %v144_v14 }
  0xa1   :  { %v206_v17 = vmul.f32 0.044715, %v190_v15  ;;  %v208_v18 = vmul.f32 0.044715, %v192_v16  ;;  %v198_v57 = vmul.f32 0.5, %v190_v15  ;;  %v200_v63 = vmul.f32 0.5, %v192_v16 }
  0xa3   :  { %v214_v19 = vmul.f32 %v206_v17, %v190_v15  ;;  %v216_v20 = vmul.f32 %v208_v18, %v192_v16 }
  0xa5   :  { %v222_v21 = vmul.f32 %v214_v19, %v190_v15  ;;  %v224_v22 = vmul.f32 %v216_v20, %v192_v16  ;;  %v149_v23 = vpop.f32.mrf.mxu2  ;;  %v154_v24 = vpop.f32.mrf.mxu3 }
  0xa6   :  { %v194_v25 = vadd.f32 %v366_v12, %v149_v23  ;;  %v442_v26 = vadd.f32 %v366_v12, %v154_v24  ;;  %v141_v27 = vpop.f32.mrf.mxu0  ;;  %v146_v28 = vpop.f32.mrf.mxu1 }
  0xa7   :  { %v230_v29 = vadd.f32 %v222_v21, %v190_v15  ;;  %v232_v30 = vadd.f32 %v224_v22, %v192_v16  ;;  %v444_v31 = vadd.f32 %v366_v12, %v141_v27  ;;  %v446_v32 = vadd.f32 %v366_v12, %v146_v28 }
  0xa8   :  { %v210_v33 = vmul.f32 0.044715, %v194_v25  ;;  %v212_v34 = vmul.f32 0.044715, %v442_v26  ;;  %v202_v13 = vmul.f32 0.5, %v194_v25  ;;  %v204_v17 = vmul.f32 0.5, %v442_v26 }
  0xa9   :  { %v238_v35 = vmul.f32 0.7978846, %v230_v29  ;;  %v240_v36 = vmul.f32 0.7978846, %v232_v30  ;;  %v207_v39 = vmul.f32 0.044715, %v444_v31 }
  0xaa   :  { %v218_v37 = vmul.f32 %v210_v33, %v194_v25  ;;  %v220_v38 = vmul.f32 %v212_v34, %v442_v26  ;;  %v209_v40 = vmul.f32 0.044715, %v446_v32  ;;  %v199_v22 = vmul.f32 0.5, %v444_v31 }
  0xab   :  { %367 = vtanh.f32 %v238_v35  ;;  %v215_v43 = vmul.f32 %v207_v39, %v444_v31  ;;  %v201_v27 = vmul.f32 0.5, %v446_v32 }
  0xac   :  { %369 = vtanh.f32 %v240_v36  ;;  %v226_v41 = vmul.f32 %v218_v37, %v194_v25  ;;  %v228_v42 = vmul.f32 %v220_v38, %v442_v26  ;;  %v217_v44 = vmul.f32 %v209_v40, %v446_v32 }
  0xad   :  { %v151_v45 = vpop.f32.mrf.mxu2  ;;  %v156_v46 = vpop.f32.mrf.mxu3  ;;  %v223_v49 = vmul.f32 %v215_v43, %v444_v31 }
  0xae   :  { %v234_v47 = vadd.f32 %v226_v41, %v194_v25  ;;  %v236_v48 = vadd.f32 %v228_v42, %v442_v26  ;;  %v195_v50 = vadd.f32 %v366_v12, %v151_v45  ;;  %v225_v51 = vmul.f32 %v217_v44, %v446_v32 }
  0xaf   :  { %v197_v52 = vadd.f32 %v366_v12, %v156_v46  ;;  %v231_v55 = vadd.f32 %v223_v49, %v444_v31 }
  0xb0   :  { %v242_v53 = vmul.f32 0.7978846, %v234_v47  ;;  %v244_v54 = vmul.f32 0.7978846, %v236_v48  ;;  %v233_v58 = vadd.f32 %v225_v51, %v446_v32  ;;  %v211_v59 = vmul.f32 0.044715, %v195_v50 }
  0xb1   :  { %v368_v56 = vpop.eup %367  ;;  %v213_v60 = vmul.f32 0.044715, %v197_v52  ;;  %v239_v0 = vmul.f32 0.7978846, %v231_v55  ;;  %v203_v31 = vmul.f32 0.5, %v195_v50  ;;  %v205_v33 = vmul.f32 0.5, %v197_v52 }
  0xb2   :  { %v370_v61 = vpop.eup %369  ;;  %v254_v62 = vadd.f32 1.0, %v368_v56  ;;  %371 = vtanh.f32 %v242_v53  ;;  %v241_v2 = vmul.f32 0.7978846, %v233_v58  ;;  %v219_v3 = vmul.f32 %v211_v59, %v195_v50 }
  0xb3   :  { %v256_v1 = vadd.f32 1.0, %v370_v61  ;;  %373 = vtanh.f32 %v244_v54  ;;  %v221_v5 = vmul.f32 %v213_v60, %v197_v52 }
  0xb4   :  { %v262_v4 = vmul.f32 %v254_v62, %v198_v57  ;;  %375 = vtanh.f32 %v239_v0  ;;  %v227_v7 = vmul.f32 %v219_v3, %v195_v50 }
  0xb5   :  { %v264_v6 = vmul.f32 %v256_v1, %v200_v63  ;;  %377 = vtanh.f32 %v241_v2  ;;  %v229_v8 = vmul.f32 %v221_v5, %v197_v52 }
  0xb6   :  { %270 = vst [vmem:[%s490_s3] sm:$0xff] %v262_v4  ;;  %v235_v9 = vadd.f32 %v227_v7, %v195_v50 }
  0xb7   :  { %272 = vst [vmem:[%s490_s3 + $0x10] sm:$0xff] %v264_v6  ;;  %v237_v11 = vadd.f32 %v229_v8, %v197_v52 }
  0xb8   :  { %v372_v10 = vpop.eup %371  ;;  %v243_v15 = vmul.f32 0.7978846, %v235_v9 }
  0xb9   :  { %v374_v12 = vpop.eup %373  ;;  %v258_v14 = vadd.f32 1.0, %v372_v10  ;;  %v245_v19 = vmul.f32 0.7978846, %v237_v11 }
  0xba   :  { %v376_v16 = vpop.eup %375  ;;  %v260_v18 = vadd.f32 1.0, %v374_v12  ;;  %379 = vtanh.f32 %v243_v15 }
  0xbb   :  { %v378_v20 = vpop.eup %377  ;;  %v266_v21 = vmul.f32 %v258_v14, %v202_v13  ;;  %v255_v23 = vadd.f32 1.0, %v376_v16  ;;  %381 = vtanh.f32 %v245_v19 }
  0xbc   :  { %v268_v24 = vmul.f32 %v260_v18, %v204_v17  ;;  %v257_v28 = vadd.f32 1.0, %v378_v20 }
  0xbd   :  { %274 = vst [vmem:[%s490_s3 + $0x20] sm:$0xff] %v266_v21  ;;  %v263_v25 = vmul.f32 %v255_v23, %v199_v22 }
  0xbe   :  { %276 = vst [vmem:[%s490_s3 + $0x30] sm:$0xff] %v268_v24  ;;  %v265_v26 = vmul.f32 %v257_v28, %v201_v27 }
  0xbf   :  { %271 = vst [vmem:[%s490_s3 + $0x8] sm:$0xff] %v263_v25 }
  0xc0   :  { %273 = vst [vmem:[%s490_s3 + $0x18] sm:$0xff] %v265_v26  ;;  %v380_v29 = vpop.eup %379 }
  0xc1   :  { %v382_v30 = vpop.eup %381  ;;  %v259_v32 = vadd.f32 1.0, %v380_v29 }
  0xc2   :  { %v261_v34 = vadd.f32 1.0, %v382_v30 }
  0xc3   :  { %v267_v35 = vmul.f32 %v259_v32, %v203_v31 }
  0xc4   :  { %v269_v36 = vmul.f32 %v261_v34, %v205_v33 }
  0xc5   :  { %275 = vst [vmem:[%s490_s3 + $0x28] sm:$0xff] %v267_v35 }
  0xc6   :  { %277 = vst [vmem:[%s490_s3 + $0x38] sm:$0xff] %v269_v36 }

// kernel: _lambda_.22
= control target key start
LH: loop header
LB: loop body
LE: loop exit
PB: predicated region body
PF: predicated region fallthrough
CT: control target
= control target key end

     0   :  { %s378_s1 = inlined_call_operand.vmem [shape: bf16[128,128], index: 1, kind: input, shape index: {}]   ;;  %s379_s2 = inlined_call_operand.vmem [shape: f32[1,128], index: 2, kind: input, shape index: {}]   ;;  %s380_s0 = inlined_call_operand.vmem [shape: bf16[64,128], index: 0, kind: input, shape index: {}]   ;;  %s381_s3 = inlined_call_operand.vmem [shape: f32[64,128], index: 3, kind: output, shape index: {}]  }
   0x1   :  { %v269_v0 = vld [vmem:[%s378_s1 + $0x38] sm:$0xff]  ;;  %v268_v1 = vld [vmem:[%s378_s1 + $0x30] sm:$0xff]  ;;  %v267_v2 = vld [vmem:[%s378_s1 + $0x28] sm:$0xff] }
   0x2   :  { %130 = vmatpush.bf16.msra.mxu0 %v269_v0  ;;  %270 = vmatpush.bf16.msra.mxu1 %v269_v0  ;;  %v266_v3 = vld [vmem:[%s378_s1 + $0x20] sm:$0xff]  ;;  %v265_v4 = vld [vmem:[%s378_s1 + $0x18] sm:$0xff]  ;;  %v264_v5 = vld [vmem:[%s378_s1 + $0x10] sm:$0xff] }
   0x3   :  { %271 = vmatpush.bf16.msra.mxu2 %v269_v0  ;;  %272 = vmatpush.bf16.msra.mxu3 %v269_v0  ;;  %v263_v6 = vld [vmem:[%s378_s1 + $0x8] sm:$0xff]  ;;  %v262_v7 = vld [vmem:[%s378_s1] sm:$0xff]  ;;  %v260_v10 = vld [vmem:[%s380_s0 + $0x10] sm:$0xff] }
   0x4   :  { %v258_v8 = vld [vmem:[%s380_s0] sm:$0xff]  ;;  %v259_v9 = vld [vmem:[%s380_s0 + $0x8] sm:$0xff]  ;;  %v261_v11 = vld [vmem:[%s380_s0 + $0x18] sm:$0xff] }
   0x5   :  { %v294_v12 = vld [vmem:[%s379_s2] ss:$0 sm:$0xff] }
   0x6   :  { %131 = vmatpush.bf16.msra.mxu0 %v268_v1  ;;  %273 = vmatpush.bf16.msra.mxu1 %v268_v1 }
   0x7   :  { %274 = vmatpush.bf16.msra.mxu2 %v268_v1  ;;  %275 = vmatpush.bf16.msra.mxu3 %v268_v1 }
   0xa   :  { %132 = vmatpush.bf16.msra.mxu0 %v267_v2  ;;  %276 = vmatpush.bf16.msra.mxu1 %v267_v2 }
   0xb   :  { %277 = vmatpush.bf16.msra.mxu2 %v267_v2  ;;  %278 = vmatpush.bf16.msra.mxu3 %v267_v2 }
   0xe   :  { %133 = vmatpush.bf16.msra.mxu0 %v266_v3  ;;  %279 = vmatpush.bf16.msra.mxu1 %v266_v3 }
   0xf   :  { %280 = vmatpush.bf16.msra.mxu2 %v266_v3  ;;  %281 = vmatpush.bf16.msra.mxu3 %v266_v3 }
  0x12   :  { %134 = vmatpush.bf16.msra.mxu0 %v265_v4  ;;  %282 = vmatpush.bf16.msra.mxu1 %v265_v4 }
  0x13   :  { %283 = vmatpush.bf16.msra.mxu2 %v265_v4  ;;  %284 = vmatpush.bf16.msra.mxu3 %v265_v4 }
  0x16   :  { %135 = vmatpush.bf16.msra.mxu0 %v264_v5  ;;  %285 = vmatpush.bf16.msra.mxu1 %v264_v5 }
  0x17   :  { %286 = vmatpush.bf16.msra.mxu2 %v264_v5  ;;  %287 = vmatpush.bf16.msra.mxu3 %v264_v5 }
  0x1a   :  { %136 = vmatpush.bf16.msra.mxu0 %v263_v6  ;;  %288 = vmatpush.bf16.msra.mxu1 %v263_v6 }
  0x1b   :  { %289 = vmatpush.bf16.msra.mxu2 %v263_v6  ;;  %290 = vmatpush.bf16.msra.mxu3 %v263_v6 }
  0x1e   :  { %137 = vmatpush.bf16.msra.mxu0 %v262_v7  ;;  %291 = vmatpush.bf16.msra.mxu1 %v262_v7 }
  0x1f   :  { %292 = vmatpush.bf16.msra.mxu2 %v262_v7  ;;  %293 = vmatpush.bf16.msra.mxu3 %v262_v7 }
  0x21   :  { %138 = vmatmul.bf16.vlgmr.msra.gmra.mxu0 %v258_v8  ;;  %143 = vmatmul.bf16.vlgmr.msra.gmra.mxu1 %v259_v9 }
  0x22   :  { %148 = vmatmul.bf16.vlgmr.msra.gmra.mxu2 %v260_v10  ;;  %153 = vmatmul.bf16.vlgmr.msra.gmra.mxu3 %v261_v11 }
  0x9e   :  { %v139_v13 = vpop.f32.mrf.mxu0  ;;  %v144_v14 = vpop.f32.mrf.mxu1 }
  0x9f   :  { %v190_v15 = vadd.f32 %v294_v12, %v139_v13  ;;  %v192_v16 = vadd.f32 %v294_v12, %v144_v14 }
  0xa1   :  { %198 = vst [vmem:[%s381_s3] sm:$0xff] %v190_v15 }
  0xa2   :  { %200 = vst [vmem:[%s381_s3 + $0x10] sm:$0xff] %v192_v16 }
  0xa5   :  { %v149_v17 = vpop.f32.mrf.mxu2  ;;  %v154_v18 = vpop.f32.mrf.mxu3 }
  0xa6   :  { %v194_v19 = vadd.f32 %v294_v12, %v149_v17  ;;  %v196_v20 = vadd.f32 %v294_v12, %v154_v18  ;;  %v141_v21 = vpop.f32.mrf.mxu0  ;;  %v146_v22 = vpop.f32.mrf.mxu1 }
  0xa7   :  { %v191_v23 = vadd.f32 %v294_v12, %v141_v21  ;;  %v193_v24 = vadd.f32 %v294_v12, %v146_v22 }
  0xa8   :  { %202 = vst [vmem:[%s381_s3 + $0x20] sm:$0xff] %v194_v19 }
  0xa9   :  { %204 = vst [vmem:[%s381_s3 + $0x30] sm:$0xff] %v196_v20 }
  0xaa   :  { %199 = vst [vmem:[%s381_s3 + $0x8] sm:$0xff] %v191_v23 }
  0xab   :  { %201 = vst [vmem:[%s381_s3 + $0x18] sm:$0xff] %v193_v24 }
  0xad   :  { %v151_v25 = vpop.f32.mrf.mxu2  ;;  %v156_v26 = vpop.f32.mrf.mxu3 }
  0xae   :  { %v195_v27 = vadd.f32 %v294_v12, %v151_v25  ;;  %v197_v28 = vadd.f32 %v294_v12, %v156_v26 }
  0xb0   :  { %203 = vst [vmem:[%s381_s3 + $0x28] sm:$0xff] %v195_v27 }
  0xb1   :  { %205 = vst [vmem:[%s381_s3 + $0x38] sm:$0xff] %v197_v28 }

// kernel: _lambda_.23
= control target key start
LH: loop header
LB: loop body
LE: loop exit
PB: predicated region body
PF: predicated region fallthrough
CT: control target
= control target key end

     0   :  { %s2160_s0 = inlined_call_operand.vmem [shape: f32[2,1,1,384], index: 0, kind: input, shape index: {}]   ;;  %s2161_s1 = inlined_call_operand.vmem [shape: f32[1,1,384], index: 1, kind: input, shape index: {}]   ;;  %s2162_s2 = inlined_call_operand.vmem [shape: f32[3,32,1], index: 2, kind: input, shape index: {}]   ;;  %s2163_s3 = inlined_call_operand.vmem [shape: f32[32,1], index: 3, kind: input, shape index: {}]   ;;  %s2164_s4 = inlined_call_operand.vmem [shape: f32[3,32,32], index: 4, kind: input, shape index: {}]   ;;  %s2165_s5 = inlined_call_operand.vmem [shape: f32[32,1], index: 5, kind: input, shape index: {}]   ;;  %s2166_s6 = inlined_call_operand.vmem [shape: f32[3,1,32], index: 6, kind: input, shape index: {}]   ;;  %s2167_s7 = inlined_call_operand.<no memory space> [shape: f32[1,1], index: 7, kind: input, shape index: {}]   ;;  %s2168_s8 = inlined_call_operand.hbm [shape: f32[2,1,1,128], index: 8, kind: output, shape index: {}]  }
   0x1   :  { %v13_v0 = vstv %s2167_s7 }
   0x2   :  { %14 = vst [vmem:[#allocation2] sm:$0x1] %v13_v0 }
   0x3   :  { %15 = vsyncpa [#allocation4], 0 }
   0x4   :  { %17 = vsyncpa [#allocation4 + $0x1], 0  ;;  %s1718_s29 = smov 0   ;;  %s1720_s30 = smov 0  }
   0x5   :  { %s1722_s9 = smov 0   ;;  %s1724_s10 = smov 0  }
   0x6   :  { %s1726_s11 = smov 0   ;;  %s1728_s12 = smov 0  }
   0x7 LB: > { %s1352_s7 = sadd.s32 4294967295, %s1665_s12   ;;  %s1353_s13 = sadd.s32 4294967294, %s1665_s12   ;;  %s1665_s12 = sphi %s1728_s12, %s23_s12   ;;  %s1661_s11 = sphi %s1726_s11, %s2175_s11   ;;  %s1657_s10 = sphi %s1724_s10, %s2174_s10   ;;  %s1653_s9 = sphi %s1722_s9, %s2173_s9   ;;  %s1649_s30 = sphi %s1720_s30, %s2172_s30   ;;  %s1645_s29 = sphi %s1718_s29, %s2171_s29  }
   0x8   : > { %s35_s14 = sadd.s32 1, %s1661_s11  ;;  %s224_s15 = sadd.s32 1, %s1653_s9 }
   0x9   : > { %p37_p0 = scmp.ge.s32.totalorder %s35_s14, 2  ;;  %p234_p1 = scmp.ne.s32.totalorder %s1653_s9, %s1649_s30 }
   0xa   : > { %p235_p2 = scmp.eq.s32.totalorder %s1352_s7, 1  ;;  %p240_p3 = scmp.ne.s32.totalorder %s1649_s30, %s1645_s29 }
   0xb   : > { %s2177_s14 = smov (%p37_p0, %s35_s14), 0  ;;  %p241_p5 = scmp.eq.s32.totalorder %s1353_s13, 1 }
   0xc   : > { %p1758_p4 = por %p235_p2, %p234_p1  ;;  %s219_s17 = ssub.s32 %s1661_s11, %s2177_s14 }
   0xd   : > { %p1357_p6 = scmp.ge.s32.totalorder %s1665_s12, 1  ;;  %p222_p7 = scmp.eq.s32.totalorder %s219_s17, 0 }
   0xe   : > { %p1765_p8 = por %p241_p5, %p240_p3  ;;  %p295_p9 = scmp.lt.s32.totalorder %s1665_s12, 3 }
   0xf   : > { %s1771_s19 = scalar_select %p222_p7, %s1653_s9, %s224_s15  }
  0x10   : > { %p296_p10 = pnand %p1357_p6, %p295_p9 }
  0x11   : > { %p335_p11 = scmp.lt.s32.totalorder (!%p296_p10), %s1657_s10, 1  ;;  %s1668_s27 = smov (!%p296_p10), 127  }
  0x12   : > { %299 = sbr.rel (%p296_p10) target bundleno = 792 (0x318), region = 52  ;;  %s1669_s28 = smov (!%p296_p10), 1  }
  0x13   : > { %s333_s15 = sand.u32 (!%p296_p10), 1, %s1649_s30   ;;  %s1607_s7 = scalar_lea.hbm (!%p296_p10), %s2168_s8, 2 }
  0x14   : > { %s334_s22 = scalar_lea.vmem (!%p296_p10), [#allocation3], %s333_s15  ;;  %s1254_s25 = scalar_lea.sflag (!%p296_p10), [#allocation4], %s333_s15 }
  0x15   : > { %s1265_s23 = sshll.u32 (!%p296_p10), %s334_s22, 4  ;;  %s1266_s23 = int_to_ptr.vmem [resolvable:$true] %s1265_s23 }
  0x17   : > { %v1667_v1 = vmov 0   ;;  %s336_s20 = scalar_select %p335_p11, %s1657_s10, 1  ;;  %v348_v2 = vld [vmem:[%s2161_s1] sm:$0x7]  ;;  %v1361_v8 = vld [vmem:[%s2162_s2 + $0x38] sm:$0xff]  ;;  %v384_v9 = vld [vmem:[%s2162_s2 + $0x10] sm:$0xff] }
  0x18   : > { %1486 = vset.pattern.permute.xlu2 %v1667_v1  ;;  %1485 = vset.pattern.permute.xlu1 %v1667_v1  ;;  %v385_v10 = vld [vmem:[%s2162_s2 + $0x18] sm:$0xff]  ;;  %v1360_v11 = vld [vmem:[%s2162_s2 + $0x30] sm:$0xff]  ;;  %v383_v13 = vld [vmem:[%s2162_s2 + $0x8] sm:$0xff]  ;;  %vm361_vm0 = vcmask 7168   ;;  %vm374_vm1 = vcmask 1039360   ;;  %vm722_vm14 = vcmask 261120  }
  0x19   : > { %1484 = vset.pattern.permute.xlu0 %v1667_v1  ;;  %s1425_s21 = smul.u32 3, %s336_s20  ;;  %v1365_v12 = vld [vmem:[%s2162_s2 + $0x58] sm:$0xff]  ;;  %v1359_v14 = vld [vmem:[%s2162_s2 + $0x28] sm:$0xff]  ;;  %v1364_v15 = vld [vmem:[%s2162_s2 + $0x50] sm:$0xff] }
  0x1a   : > { %v382_v16 = vld [vmem:[%s2162_s2] sm:$0xff]  ;;  %v1363_v18 = vld [vmem:[%s2162_s2 + $0x48] sm:$0xff]  ;;  %v528_v19 = vld [vmem:[%s2163_s3 + $0x18] sm:$0xff] }
  0x1b   : > { %s342_s26 = scalar_lea.vmem %s2160_s0, %s1425_s21  ;;  %v1358_v17 = vld [vmem:[%s2162_s2 + $0x20] sm:$0xff]  ;;  %v527_v21 = vld [vmem:[%s2163_s3 + $0x10] sm:$0xff]  ;;  %v526_v22 = vld [vmem:[%s2163_s3 + $0x8] sm:$0xff]  ;;  %s1263_s21 = scalar_lea.hbm %s2168_s8, %s1657_s10 }
  0x1c   : > { %v347_v3 = vld [vmem:[%s342_s26] sm:$0x7]  ;;  %s1267_s24 = sshll.u32 %s1263_s21, 4  ;;  %s1268_s24 = int_to_ptr.hbm [resolvable:$true] %s1267_s24 }
  0x1d   : > { %v349_v4 = vmul.f32 %v348_v2, %v347_v3  ;;  %v1362_v20 = vld [vmem:[%s2162_s2 + $0x40] sm:$0xff]  ;;  %s1601_s26 = sshra.s32 %s1268_s24, 4  ;;  %s1602_s26 = int_to_ptr.hbm [resolvable:$true] %s1601_s26 }
  0x1e   : > { %v525_v23 = vld [vmem:[%s2163_s3] sm:$0xff]  ;;  %p1608_p1 = scmp.lt.s32.totalorder %s1602_s26, %s2168_s8 }
  0x1f   : > { %v1781_v5 = vperm.slane %v349_v4, 1  ;;  %v1783_v6 = vperm.slane %v349_v4, 2  ;;  %v1791_v7 = vperm.slane %v349_v4, 0 }
  0x21   : > { %370 = vrot.lane.b32.xlu2 %v1781_v5, %s1668_s27  ;;  %359 = vrot.lane.b32.xlu1 %v1781_v5, %s1669_s28 }
  0x22   : > { %352 = vrot.lane.b32.xlu0 %v1783_v6, %s1669_s28 }
  0x29   : > { %368 = vrot.lane.b32.xlu1 %v1791_v7, %s1668_s27  ;;  %372 = vrot.lane.b32.xlu2 %v1783_v6, %s1668_s27 }
  0x2a   : > { %357 = vrot.lane.b32.xlu0 %v1791_v7, %s1669_s28 }
  0x31   : > { %443 = vperm.xlu1 %1485, %v1361_v8   ;;  %398 = vperm.xlu2 %1486, %v384_v9  }
  0x32   : > { %403 = vperm.xlu0 %1484, %v385_v10  }
  0x39   : > { %438 = vperm.xlu1 %1485, %v1360_v11   ;;  %495 = vperm.xlu2 %1486, %v1365_v12  }
  0x3a   : > { %393 = vperm.xlu0 %1484, %v383_v13  }
  0x41   : > { %433 = vperm.xlu1 %1485, %v1359_v14   ;;  %490 = vperm.xlu2 %1486, %v1364_v15  }
  0x42   : > { %388 = vperm.xlu0 %1484, %v382_v16  }
  0x49   : > { %428 = vperm.xlu1 %1485, %v1358_v17   ;;  %485 = vperm.xlu2 %1486, %v1363_v18  }
  0x4a   : > { %546 = vperm.xlu0 %1484, %v528_v19  }
  0x51   : > { %480 = vperm.xlu1 %1485, %v1362_v20   ;;  %541 = vperm.xlu2 %1486, %v527_v21  }
  0x52   : > { %536 = vperm.xlu0 %1484, %v526_v22  }
  0x59   : > { %531 = vperm.xlu1 %1485, %v525_v23  }
  0x7b   : > { %v371_v24 = vpop.permute.xlu2 %370 }
  0x83   : > { %v373_v25 = vpop.permute.xlu2 %372 }
  0x84   : > { %v376_v46 = vsel %vm374_vm1, %v371_v24, %v373_v25 }
  0x85   : > { %v1875_v59 = vperm.slane %v376_v46, 0 }
  0x8b   : > { %v399_v26 = vpop.permute.xlu2 %398 }
  0x93   : > { %v360_v27 = vpop.permute.xlu1 %359  ;;  %v1847_v28 = vpop.permute.xlu2 %495 }
  0x94   : > { %v353_v29 = vpop.permute.xlu0 %352 }
  0x95   : > { %v363_v34 = vsel %vm361_vm0, %v360_v27, %v353_v29 }
  0x96   : > { %v1852_v38 = vperm.slane %v363_v34, 0 }
  0x98   : > { %v417_v48 = vmul.f32 %v1852_v38, %v399_v26 }
  0x9b   : > { %v369_v30 = vpop.permute.xlu1 %368  ;;  %v491_v32 = vpop.permute.xlu2 %490 }
  0x9c   : > { %v358_v31 = vpop.permute.xlu0 %357  ;;  %v375_v37 = vsel %vm374_vm1, %v369_v30, %v371_v24  ;;  %v381_v39 = vsel %vm374_vm1, %v373_v25, %v369_v30  ;;  %v508_v63 = vmul.f32 %v1875_v59, %v491_v32  ;;  %v511_v24 = vmul.f32 %v1875_v59, %v1847_v28 }
  0x9d   : > { %v367_v36 = vsel %vm361_vm0, %v353_v29, %v358_v31  ;;  %v362_v40 = vsel %vm361_vm0, %v358_v31, %v360_v27  ;;  %v1860_v43 = vperm.slane %v375_v37, 0  ;;  %v1862_v44 = vperm.slane %v381_v39, 0 }
  0x9e   : > { %v1858_v42 = vperm.slane %v367_v36, 0  ;;  %v1864_v45 = vperm.slane %v362_v40, 0 }
  0x9f   : > { %v507_v54 = vmul.f32 %v1860_v43, %v491_v32  ;;  %v509_v55 = vmul.f32 %v1862_v44, %v491_v32  ;;  %v510_v25 = vmul.f32 %v1860_v43, %v1847_v28 }
  0xa0   : > { %v415_v49 = vmul.f32 %v1858_v42, %v399_v26  ;;  %v416_v56 = vmul.f32 %v1864_v45, %v399_v26  ;;  %v512_v26 = vmul.f32 %v1862_v44, %v1847_v28 }
  0xa3   : > { %v444_v33 = vpop.permute.xlu1 %443  ;;  %v1856_v41 = vpop.permute.xlu2 %485 }
  0xa4   : > { %v404_v35 = vpop.permute.xlu0 %403  ;;  %v458_v1 = vmul.f32 %v444_v33, %v1791_v7  ;;  %v459_v2 = vmul.f32 %v444_v33, %v1781_v5  ;;  %v460_v8 = vmul.f32 %v444_v33, %v1783_v6  ;;  %v504_v34 = vmul.f32 %v1860_v43, %v1856_v41 }
  0xa5   : > { %v418_v9 = vmul.f32 %v1858_v42, %v404_v35  ;;  %v419_v10 = vmul.f32 %v1864_v45, %v404_v35  ;;  %v420_v11 = vmul.f32 %v1852_v38, %v404_v35 }
  0xa7   : > { %v470_v18 = vadd.f32 %v458_v1, %v418_v9  ;;  %v471_v19 = vadd.f32 %v459_v2, %v419_v10  ;;  %v472_v20 = vadd.f32 %v460_v8, %v420_v11 }
  0xa9   : > { %v522_v31 = vadd.f32 %v510_v25, %v470_v18  ;;  %v523_v32 = vadd.f32 %v511_v24, %v471_v19  ;;  %v524_v33 = vadd.f32 %v512_v26, %v472_v20 }
  0xab   : > { %v439_v47 = vpop.permute.xlu1 %438  ;;  %v542_v0 = vpop.permute.xlu2 %541 }
  0xac   : > { %v455_v50 = vmul.f32 %v439_v47, %v1791_v7  ;;  %v456_v51 = vmul.f32 %v439_v47, %v1781_v5  ;;  %v457_v52 = vmul.f32 %v439_v47, %v1783_v6  ;;  %v394_v53 = vpop.permute.xlu0 %393 }
  0xad   : > { %v412_v36 = vmul.f32 %v1858_v42, %v394_v53  ;;  %v414_v37 = vmul.f32 %v1852_v38, %v394_v53 }
  0xae   : > { %v467_v57 = vadd.f32 %v455_v50, %v415_v49  ;;  %v469_v58 = vadd.f32 %v457_v52, %v417_v48  ;;  %v468_v60 = vadd.f32 %v456_v51, %v416_v56  ;;  %v413_v48 = vmul.f32 %v1864_v45, %v394_v53 }
  0xb0   : > { %v519_v61 = vadd.f32 %v507_v54, %v467_v57  ;;  %v521_v62 = vadd.f32 %v509_v55, %v469_v58  ;;  %v520_v13 = vadd.f32 %v508_v63, %v468_v60  ;;  %v505_v54 = vmul.f32 %v1875_v59, %v1856_v41 }
  0xb1   : > { %v506_v55 = vmul.f32 %v1862_v44, %v1856_v41 }
  0xb2   : > { %v555_v3 = vadd.f32 %v542_v0, %v519_v61  ;;  %v557_v4 = vadd.f32 %v542_v0, %v521_v62  ;;  %v556_v22 = vadd.f32 %v542_v0, %v520_v13 }
  0xb3   : > { %v434_v12 = vpop.permute.xlu1 %433 }
  0xb4   : > { %vm567_vm2 = vcmp.ge.f32.partialorder %v555_v3, 0.0  ;;  %vm569_vm3 = vcmp.ge.f32.partialorder %v557_v4, 0.0  ;;  %v579_v14 = vmul.f32 0.2, %v555_v3  ;;  %v1884_v15 = vpop.permute.xlu0 %388  ;;  %v581_v16 = vmul.f32 0.2, %v557_v4 }
  0xb5   : > { %v452_v27 = vmul.f32 %v434_v12, %v1791_v7  ;;  %v454_v29 = vmul.f32 %v434_v12, %v1783_v6  ;;  %v580_v35 = vmul.f32 0.2, %v556_v22  ;;  %v453_v28 = vmul.f32 %v434_v12, %v1781_v5 }
  0xb6   : > { %v1886_v17 = vsel %vm567_vm2, %v555_v3, %v579_v14  ;;  %v1888_v21 = vsel %vm569_vm3, %v557_v4, %v581_v16  ;;  %vm568_vm4 = vcmp.ge.f32.partialorder %v556_v22, 0.0  ;;  %v409_v4 = vmul.f32 %v1858_v42, %v1884_v15 }
  0xb7   : > { %v1492_v23 = vpack.i.bf16 %v1886_v17, %v1888_v21  ;;  %v464_v49 = vadd.f32 %v452_v27, %v412_v36  ;;  %v466_v50 = vadd.f32 %v454_v29, %v414_v37  ;;  %v465_v57 = vadd.f32 %v453_v28, %v413_v48 }
  0xb8   : > { %v1913_v60 = vsel %vm568_vm4, %v556_v22, %v580_v35  ;;  %v410_v8 = vmul.f32 %v1864_v45, %v1884_v15  ;;  %v411_v42 = vmul.f32 %v1852_v38, %v1884_v15 }
  0xb9   : > { %1493 = vrot.lane.b32.xlu0 %v1492_v23, %s1669_s28  ;;  %v516_v61 = vadd.f32 %v504_v34, %v464_v49  ;;  %v518_v2 = vadd.f32 %v506_v55, %v466_v50  ;;  %v517_v12 = vadd.f32 %v505_v54, %v465_v57  ;;  %v1040_v49 = vld [vmem:[%s2165_s5 + $0x18] sm:$0xff]  ;;  %v1038_v50 = vld [vmem:[%s2165_s5 + $0x8] sm:$0xff] }
  0xba   : > { %v1369_v54 = vld [vmem:[%s2164_s4 + $0x38] sm:$0xff]  ;;  %v1367_v55 = vld [vmem:[%s2164_s4 + $0x28] sm:$0xff] }
  0xbb   : > { %v429_v30 = vpop.permute.xlu1 %428 }
  0xbc   : > { %v547_v39 = vpop.permute.xlu0 %546  ;;  %v449_v41 = vmul.f32 %v429_v30, %v1791_v7  ;;  %v450_v0 = vmul.f32 %v429_v30, %v1781_v5  ;;  %v451_v9 = vmul.f32 %v429_v30, %v1783_v6 }
  0xbd   : > { %v558_v40 = vadd.f32 %v547_v39, %v522_v31  ;;  %v559_v46 = vadd.f32 %v547_v39, %v523_v32  ;;  %v560_v47 = vadd.f32 %v547_v39, %v524_v33 }
  0xbe   : > { %v461_v13 = vadd.f32 %v449_v41, %v409_v4  ;;  %v462_v14 = vadd.f32 %v450_v0, %v410_v8  ;;  %v463_v16 = vadd.f32 %v451_v9, %v411_v42 }
  0xbf   : > { %vm571_vm5 = vcmp.ge.f32.partialorder %v559_v46, 0.0  ;;  %vm572_vm6 = vcmp.ge.f32.partialorder %v560_v47, 0.0  ;;  %v582_v51 = vmul.f32 0.2, %v558_v40  ;;  %v583_v52 = vmul.f32 0.2, %v559_v46 }
  0xc0   : > { %v584_v56 = vmul.f32 0.2, %v560_v47  ;;  %vm570_vm7 = vcmp.ge.f32.partialorder %v558_v40, 0.0 }
  0xc1   : > { %v1911_v58 = vsel %vm570_vm7, %v558_v40, %v582_v51  ;;  %v1915_v53 = vsel %vm571_vm5, %v559_v46, %v583_v52  ;;  %v1039_v40 = vld [vmem:[%s2165_s5 + $0x10] sm:$0xff]  ;;  %v1527_v46 = vpack.i.bf16 %v1888_v21, %v1913_v60  ;;  %v1366_v52 = vld [vmem:[%s2164_s4 + $0x20] sm:$0xff] }
  0xc2   : > { %747 = vmatpush.msra.mxu0 %v1911_v58  ;;  %1417 = vmatpush.msra.mxu1 %v1911_v58  ;;  %v1919_v62 = vsel %vm572_vm6, %v560_v47, %v584_v56  ;;  %v1507_v63 = vpack.i.bf16 %v1913_v60, %v1915_v53  ;;  %v1517_v28 = vpack.i.bf16 %v1915_v53, %v1911_v58  ;;  %v1368_v51 = vld [vmem:[%s2164_s4 + $0x30] sm:$0xff] }
  0xc3   : > { %1418 = vmatpush.msra.mxu2 %v1911_v58  ;;  %v481_v1 = vpop.permute.xlu1 %480  ;;  %v1487_v3 = vpack.i.bf16 %v1911_v58, %v1919_v62  ;;  %v1522_v23 = vpack.i.bf16 %v1886_v17, %v1919_v62 }
  0xc4   : > { %748 = vmatpush.msra.mxu0 %v1886_v17  ;;  %1419 = vmatpush.msra.mxu1 %v1886_v17  ;;  %v537_v5 = vpop.permute.xlu0 %536  ;;  %v501_v7 = vmul.f32 %v1860_v43, %v481_v1  ;;  %v502_v45 = vmul.f32 %v1875_v59, %v481_v1  ;;  %v503_v6 = vmul.f32 %v1862_v44, %v481_v1 }
  0xc5   : > { %1420 = vmatpush.msra.mxu2 %v1886_v17  ;;  %v552_v10 = vadd.f32 %v537_v5, %v516_v61  ;;  %v554_v11 = vadd.f32 %v537_v5, %v518_v2  ;;  %1488 = vrot.lane.b32.xlu2 %v1487_v3, %s1669_s28  ;;  %v553_v18 = vadd.f32 %v537_v5, %v517_v12 }
  0xc6   : > { %1508 = vrot.lane.b32.xlu0 %v1507_v63, %s1669_s28  ;;  %v513_v22 = vadd.f32 %v501_v7, %v461_v13  ;;  %v514_v38 = vadd.f32 %v502_v45, %v462_v14  ;;  %v515_v15 = vadd.f32 %v503_v6, %v463_v16 }
  0xc7   : > { %vm566_vm8 = vcmp.ge.f32.partialorder %v554_v11, 0.0  ;;  %v576_v43 = vmul.f32 0.2, %v552_v10  ;;  %v578_v19 = vmul.f32 0.2, %v554_v11  ;;  %vm564_vm9 = vcmp.ge.f32.partialorder %v552_v10, 0.0 }
  0xc8   : > { %v577_v25 = vmul.f32 0.2, %v553_v18  ;;  %vm565_vm10 = vcmp.ge.f32.partialorder %v553_v18, 0.0 }
  0xc9   : > { %v588_v20 = vsel %vm564_vm9, %v552_v10, %v576_v43  ;;  %v590_v59 = vsel %vm566_vm8, %v554_v11, %v578_v19 }
  0xca   : > { %749 = vmatpush.msra.mxu0 %v588_v20  ;;  %1421 = vmatpush.msra.mxu1 %v588_v20  ;;  %v1497_v24 = vpack.i.bf16 %v588_v20, %v590_v59  ;;  %v589_v35 = vsel %vm565_vm10, %v553_v18, %v577_v25  ;;  %v713_v18 = vld [vmem:[%s2164_s4] sm:$0xff] }
  0xcb   : > { %1422 = vmatpush.msra.mxu2 %v588_v20  ;;  %v532_v44 = vpop.permute.xlu1 %531  ;;  %v1532_v47 = vpack.i.bf16 %v589_v35, %v588_v20 }
  0xcc   : > { %v549_v26 = vadd.f32 %v532_v44, %v513_v22  ;;  %v550_v27 = vadd.f32 %v532_v44, %v514_v38  ;;  %v551_v29 = vadd.f32 %v532_v44, %v515_v15  ;;  %1498 = vrot.lane.b32.xlu1 %v1497_v24, %s1669_s28 }
  0xce   : > { %vm562_vm11 = vcmp.ge.f32.partialorder %v550_v27, 0.0  ;;  %vm563_vm12 = vcmp.ge.f32.partialorder %v551_v29, 0.0  ;;  %v573_v30 = vmul.f32 0.2, %v549_v26  ;;  %v574_v31 = vmul.f32 0.2, %v550_v27  ;;  %1523 = vrot.lane.b32.xlu0 %v1522_v23, %s1668_s27 }
  0xcf   : > { %v575_v32 = vmul.f32 0.2, %v551_v29  ;;  %vm561_vm13 = vcmp.ge.f32.partialorder %v549_v26, 0.0  ;;  %v714_v23 = vld [vmem:[%s2164_s4 + $0x8] sm:$0xff] }
  0xd0   : > { %v585_v33 = vsel %vm561_vm13, %v549_v26, %v573_v30  ;;  %v586_v34 = vsel %vm562_vm11, %v550_v27, %v574_v31 }
  0xd1   : > { %750 = vmatpush.msra.mxu0 %v585_v33  ;;  %1423 = vmatpush.msra.mxu1 %v585_v33  ;;  %v1512_v17 = vpack.i.bf16 %v586_v34, %v589_v35  ;;  %v587_v36 = vsel %vm563_vm12, %v551_v29, %v575_v32  ;;  %v1537_v37 = vpack.i.bf16 %v585_v33, %v590_v59 }
  0xd2   : > { %1424 = vmatpush.msra.mxu2 %v585_v33  ;;  %v1502_v39 = vpack.i.bf16 %v585_v33, %v587_v36  ;;  %v1542_v48 = vpack.i.bf16 %v587_v36, %v586_v34  ;;  %1372 = vmatmul.msk.f32.vlgmr.msra.gmra.mxu1 %vm722_vm14, %v1368_v51 }
  0xd3   : > { %776 = vmatpush.msrb.mxu1 %v1915_v53  ;;  %1370 = vmatmul.msk.f32.vlgmr.msra.gmra.mxu0 %vm722_vm14, %v1366_v52 }
  0xd4   : > { %805 = vmatpush.msrb.mxu2 %v1919_v62  ;;  %1503 = vrot.lane.b32.xlu2 %v1502_v39, %s1669_s28 }
  0xd5   : > { %777 = vmatpush.msrb.mxu1 %v1913_v60  ;;  %1513 = vrot.lane.b32.xlu1 %v1512_v17, %s1669_s28 }
  0xd6   : > { %806 = vmatpush.msrb.mxu2 %v1888_v21  ;;  %1538 = vrot.lane.b32.xlu0 %v1537_v37, %s1668_s27  ;;  %v1037_v21 = vld [vmem:[%s2165_s5] sm:$0xff] }
  0xd7   : > { %778 = vmatpush.msrb.mxu1 %v589_v35  ;;  %1373 = vmatmul.msk.f32.vlgmr.msra.gmra.mxu2 %vm722_vm14, %v1369_v54 }
  0xd8   : > { %807 = vmatpush.msrb.mxu2 %v590_v59 }
  0xd9   : > { %779 = vmatpush.msrb.mxu1 %v586_v34 }
  0xda   : > { %808 = vmatpush.msrb.mxu2 %v587_v36  ;;  %1374 = vmatmul.msk.f32.vlgmr.msrb.gmra.mxu1 %vm722_vm14, %v1366_v52 }
  0xdb   : > { %1371 = vmatmul.msk.f32.gmra.mxu0 %vm722_vm14, %v1367_v55 }
  0xdc   : > { %1518 = vrot.lane.b32.xlu2 %v1517_v28, %s1668_s27  ;;  %v715_v28 = vld [vmem:[%s2164_s4 + $0x10] sm:$0xff] }
  0xdd   : > { %1528 = vrot.lane.b32.xlu1 %v1527_v46, %s1668_s27 }
  0xde   : > { %1053 = vperm.xlu0 %1484, %v1039_v40  }
  0xdf   : > { %1378 = vmatmul.msk.f32.vlgmr.msrb.gmra.mxu2 %vm722_vm14, %v1366_v52 }
  0xe2   : > { %1375 = vmatmul.msk.f32.gmra.mxu1 %vm722_vm14, %v1367_v55 }
  0xe4   : > { %1533 = vrot.lane.b32.xlu2 %v1532_v47, %s1668_s27 }
  0xe5   : > { %1543 = vrot.lane.b32.xlu1 %v1542_v48, %s1668_s27 }
  0xe7   : > { %1379 = vmatmul.msk.f32.gmra.mxu2 %vm722_vm14, %v1367_v55 }
  0xea   : > { %1376 = vmatmul.msk.f32.gmra.mxu1 %vm722_vm14, %v1368_v51 }
  0xec   : > { %1058 = vperm.xlu2 %1486, %v1040_v49  }
  0xed   : > { %1048 = vperm.xlu1 %1485, %v1038_v50  }
  0xef   : > { %1380 = vmatmul.msk.f32.gmra.mxu2 %vm722_vm14, %v1368_v51  ;;  %v1394_v51 = vld [vmem:[%s2164_s4 + $0x40] sm:$0xff] }
  0xf2   : > { %1377 = vmatmul.msk.f32.gmra.mxu1 %vm722_vm14, %v1369_v54 }
  0xf4   : > { %1043 = vperm.xlu2 %1486, %v1037_v21  }
  0xf7   : > { %1381 = vmatmul.msk.f32.gmra.mxu2 %vm722_vm14, %v1369_v54 }
 0x11f   : > { %v1489_v56 = vpop.permute.xlu2 %1488 }
 0x120   : > { %v1491_v57 = vunpack.i.h.bf16 %v1489_v56  ;;  %v1490_v58 = vunpack.i.l.bf16 %v1489_v56  ;;  %v716_v56 = vld [vmem:[%s2164_s4 + $0x18] sm:$0xff] }
 0x122   : > { %v660_v60 = vsel %vm361_vm0, %v1490_v58, %v1491_v57 }
 0x123   : > { %846 = vmatpush.msra.mxu3 %v660_v60  ;;  %v1397_v60 = vld [vmem:[%s2164_s4 + $0x58] sm:$0xff] }
 0x12b   : > { %v1494_v53 = vpop.permute.xlu0 %1493 }
 0x12c   : > { %v1496_v61 = vunpack.i.h.bf16 %v1494_v53  ;;  %v1495_v62 = vunpack.i.l.bf16 %v1494_v53 }
 0x12e   : > { %v1504_v63 = vpop.permute.xlu2 %1503  ;;  %v659_v41 = vsel %vm361_vm0, %v1495_v62, %v1496_v61 }
 0x12f   : > { %847 = vmatpush.msra.mxu3 %v659_v41  ;;  %v1506_v45 = vunpack.i.h.bf16 %v1504_v63  ;;  %v1505_v6 = vunpack.i.l.bf16 %v1504_v63 }
 0x131   : > { %v657_v19 = vsel %vm361_vm0, %v1505_v6, %v1506_v45 }
 0x136   : > { %v1519_v0 = vpop.permute.xlu2 %1518 }
 0x137   : > { %v1521_v1 = vunpack.i.h.bf16 %v1519_v0  ;;  %v1520_v2 = vunpack.i.l.bf16 %v1519_v0 }
 0x138   : > { %v1509_v3 = vpop.permute.xlu0 %1508 }
 0x139   : > { %v1511_v4 = vunpack.i.h.bf16 %v1509_v3  ;;  %v1510_v8 = vunpack.i.l.bf16 %v1509_v3  ;;  %v691_v9 = vsel %vm374_vm1, %v1520_v2, %v1521_v1 }
 0x13a   : > { %950 = vmatpush.msra.mxu2 %v691_v9 }
 0x13b   : > { %v643_v5 = vsel %vm361_vm0, %v1491_v57, %v1510_v8  ;;  %v644_v7 = vsel %vm361_vm0, %v1510_v8, %v1490_v58  ;;  %v641_v10 = vsel %vm361_vm0, %v1496_v61, %v1511_v4  ;;  %v642_v11 = vsel %vm361_vm0, %v1511_v4, %v1495_v62  ;;  %v1395_v57 = vld [vmem:[%s2164_s4 + $0x48] sm:$0xff]  ;;  %v1396_v58 = vld [vmem:[%s2164_s4 + $0x50] sm:$0xff] }
 0x13c   : > { %875 = vmatpush.msrb.mxu0 %v643_v5  ;;  %904 = vmatpush.msra.mxu1 %v644_v7 }
 0x13e   : > { %876 = vmatpush.msrb.mxu0 %v641_v10  ;;  %905 = vmatpush.msra.mxu1 %v642_v11  ;;  %v1499_v42 = vpop.permute.xlu1 %1498  ;;  %v1534_v24 = vpop.permute.xlu2 %1533 }
 0x13f   : > { %v1501_v13 = vunpack.i.h.bf16 %v1499_v42  ;;  %v1500_v14 = vunpack.i.l.bf16 %v1499_v42  ;;  %v1536_v30 = vunpack.i.h.bf16 %v1534_v24  ;;  %v1535_v31 = vunpack.i.l.bf16 %v1534_v24 }
 0x140   : > { %v1524_v12 = vpop.permute.xlu0 %1523 }
 0x141   : > { %v1525_v43 = vunpack.i.l.bf16 %v1524_v12  ;;  %v658_v16 = vsel %vm361_vm0, %v1500_v14, %v1501_v13  ;;  %v1526_v33 = vunpack.i.h.bf16 %v1524_v12  ;;  %v687_v40 = vsel %vm374_vm1, %v1535_v31, %v1536_v30 }
 0x142   : > { %848 = vmatpush.msra.mxu3 %v658_v16 }
 0x143   : > { %v692_v20 = vsel %vm374_vm1, %v1521_v1, %v1525_v43  ;;  %v712_v29 = vsel %vm374_vm1, %v1525_v43, %v1520_v2 }
 0x144   : > { %849 = vmatpush.msra.mxu3 %v657_v19 }
 0x145   : > { %1382 = vmatmul.msk.f32.vlgmr.msra.gmra.mxu3 %vm722_vm14, %v713_v18 }
 0x146   : > { %979 = vmatpush.msrb.mxu3 %v692_v20 }
 0x147   : > { %v1514_v22 = vpop.permute.xlu1 %1513 }
 0x148   : > { %v1516_v38 = vunpack.i.h.bf16 %v1514_v22  ;;  %v1515_v15 = vunpack.i.l.bf16 %v1514_v22  ;;  %v1539_v27 = vpop.permute.xlu0 %1538 }
 0x149   : > { %v1540_v34 = vunpack.i.l.bf16 %v1539_v27  ;;  %v1541_v49 = vunpack.i.h.bf16 %v1539_v27 }
 0x14a   : > { %v639_v59 = vsel %vm361_vm0, %v1501_v13, %v1515_v15  ;;  %v640_v44 = vsel %vm361_vm0, %v1515_v15, %v1500_v14  ;;  %v637_v25 = vsel %vm361_vm0, %v1506_v45, %v1516_v38  ;;  %v638_v26 = vsel %vm361_vm0, %v1516_v38, %v1505_v6 }
 0x14b   : > { %877 = vmatpush.msrb.mxu0 %v639_v59  ;;  %906 = vmatpush.msra.mxu1 %v640_v44  ;;  %v688_v46 = vsel %vm374_vm1, %v1536_v30, %v1540_v34  ;;  %v710_v47 = vsel %vm374_vm1, %v1540_v34, %v1535_v31 }
 0x14d   : > { %878 = vmatpush.msrb.mxu0 %v637_v25  ;;  %907 = vmatpush.msra.mxu1 %v638_v26 }
 0x14e   : > { %1383 = vmatmul.msk.f32.gmra.mxu3 %vm722_vm14, %v714_v23  ;;  %1386 = vmatmul.msk.f32.vlgmr.msrb.gmra.mxu0 %vm722_vm14, %v713_v18 }
 0x14f   : > { %1390 = vmatmul.msk.f32.vlgmr.msra.gmra.mxu1 %vm722_vm14, %v713_v18  ;;  %1008 = vmatpush.msra.mxu0 %v712_v29  ;;  %v1529_v32 = vpop.permute.xlu1 %1528  ;;  %v758_v61 = vpop.f32.mrf.mxu1 }
 0x150   : > { %v1531_v35 = vunpack.i.h.bf16 %v1529_v32  ;;  %v1530_v17 = vunpack.i.l.bf16 %v1529_v32  ;;  %v752_v62 = vpop.f32.mrf.mxu0  ;;  %v1054_v34 = vpop.permute.xlu0 %1053 }
 0x152   : > { %v689_v36 = vsel %vm374_vm1, %v1526_v33, %v1530_v17  ;;  %v690_v37 = vsel %vm374_vm1, %v1530_v17, %v1531_v35  ;;  %v711_v39 = vsel %vm374_vm1, %v1531_v35, %v1526_v33 }
 0x153   : > { %951 = vmatpush.msra.mxu2 %v689_v36  ;;  %980 = vmatpush.msrb.mxu3 %v690_v37 }
 0x154   : > { %1009 = vmatpush.msra.mxu0 %v711_v39 }
 0x155   : > { %952 = vmatpush.msra.mxu2 %v687_v40  ;;  %981 = vmatpush.msrb.mxu3 %v688_v46  ;;  %v1059_v46 = vpop.permute.xlu2 %1058 }
 0x156   : > { %1010 = vmatpush.msra.mxu0 %v710_v47  ;;  %1384 = vmatmul.msk.f32.gmra.mxu3 %vm722_vm14, %v715_v28 }
 0x157   : > { %1387 = vmatmul.msk.f32.gmra.mxu0 %vm722_vm14, %v714_v23  ;;  %1391 = vmatmul.msk.f32.gmra.mxu1 %vm722_vm14, %v714_v23  ;;  %v1544_v48 = vpop.permute.xlu1 %1543  ;;  %v781_v41 = vpop.f32.mrf.mxu1 }
 0x158   : > { %v1546_v50 = vunpack.i.h.bf16 %v1544_v48  ;;  %v1545_v21 = vunpack.i.l.bf16 %v1544_v48  ;;  %v755_v0 = vpop.f32.mrf.mxu0 }
 0x15a   : > { %v685_v52 = vsel %vm374_vm1, %v1541_v49, %v1545_v21  ;;  %v686_v54 = vsel %vm374_vm1, %v1545_v21, %v1546_v50  ;;  %v709_v55 = vsel %vm374_vm1, %v1546_v50, %v1541_v49  ;;  %v761_v53 = vpop.f32.mrf.mxu2 }
 0x15b   : > { %953 = vmatpush.msra.mxu2 %v685_v52  ;;  %982 = vmatpush.msrb.mxu3 %v686_v54 }
 0x15c   : > { %1011 = vmatpush.msra.mxu0 %v709_v55  ;;  %1398 = vmatmul.msk.f32.vlgmr.msra.gmra.mxu2 %vm722_vm14, %v1394_v51 }
 0x15e   : > { %1385 = vmatmul.msk.f32.gmra.mxu3 %vm722_vm14, %v716_v56 }
 0x15f   : > { %1388 = vmatmul.msk.f32.gmra.mxu0 %vm722_vm14, %v715_v28  ;;  %1392 = vmatmul.msk.f32.gmra.mxu1 %vm722_vm14, %v715_v28  ;;  %v784_v2 = vpop.f32.mrf.mxu1  ;;  %v2080_v15 = vpop.permute.xlu1 %1048 }
 0x162   : > { %v2070_v63 = vpop.f32.mrf.mxu2 }
 0x164   : > { %1399 = vmatmul.msk.f32.gmra.mxu2 %vm722_vm14, %v1395_v57 }
 0x166   : > { %1402 = vmatmul.msk.f32.vlgmr.msrb.gmra.mxu3 %vm722_vm14, %v1394_v51 }
 0x167   : > { %1389 = vmatmul.msk.f32.gmra.mxu0 %vm722_vm14, %v716_v56  ;;  %1393 = vmatmul.msk.f32.gmra.mxu1 %vm722_vm14, %v716_v56  ;;  %v787_v5 = vpop.f32.mrf.mxu1 }
 0x16a   : > { %v2072_v1 = vpop.f32.mrf.mxu2 }
 0x16c   : > { %1400 = vmatmul.msk.f32.gmra.mxu2 %vm722_vm14, %v1396_v58 }
 0x16e   : > { %1403 = vmatmul.msk.f32.gmra.mxu3 %vm722_vm14, %v1395_v57 }
 0x16f   : > { %1406 = vmatmul.msk.f32.vlgmr.msra.gmra.mxu0 %vm722_vm14, %v1394_v51  ;;  %v790_v42 = vpop.f32.mrf.mxu1 }
 0x172   : > { %v816_v9 = vpop.f32.mrf.mxu2 }
 0x174   : > { %1401 = vmatmul.msk.f32.gmra.mxu2 %vm722_vm14, %v1397_v60 }
 0x176   : > { %1404 = vmatmul.msk.f32.gmra.mxu3 %vm722_vm14, %v1396_v58 }
 0x177   : > { %1407 = vmatmul.msk.f32.gmra.mxu0 %vm722_vm14, %v1395_v57 }
 0x17a   : > { %v2076_v11 = vpop.f32.mrf.mxu2 }
 0x17e   : > { %1405 = vmatmul.msk.f32.gmra.mxu3 %vm722_vm14, %v1397_v60 }
 0x17f   : > { %1408 = vmatmul.msk.f32.gmra.mxu0 %vm722_vm14, %v1396_v58 }
 0x187   : > { %1409 = vmatmul.msk.f32.gmra.mxu0 %vm722_vm14, %v1397_v60 }
 0x1c8   : > { %v851_v3 = vpop.f32.mrf.mxu3 }
 0x1c9   : > { %v2074_v4 = vadd.f32 %v851_v3, %v752_v62 }
 0x1cb   : > { %v880_v8 = vpop.f32.mrf.mxu0 }
 0x1cc   : > { %v909_v14 = vpop.f32.mrf.mxu1  ;;  %v881_v56 = vadd.f32 %v880_v8, %v781_v41 }
 0x1cd   : > { %v910_v57 = vadd.f32 %v909_v14, %v2070_v63  ;;  %v1044_v63 = vpop.permute.xlu2 %1043 }
 0x1d1   : > { %v854_v7 = vpop.f32.mrf.mxu3 }
 0x1d2   : > { %v855_v19 = vadd.f32 %v854_v7, %v755_v0 }
 0x1d4   : > { %v883_v10 = vpop.f32.mrf.mxu0  ;;  %v912_v20 = vpop.f32.mrf.mxu1 }
 0x1d5   : > { %v884_v44 = vadd.f32 %v883_v10, %v784_v2  ;;  %v913_v2 = vadd.f32 %v912_v20, %v2072_v1 }
 0x1d9   : > { %v857_v45 = vpop.f32.mrf.mxu3 }
 0x1da   : > { %v858_v25 = vadd.f32 %v857_v45, %v758_v61 }
 0x1dc   : > { %v886_v6 = vpop.f32.mrf.mxu0  ;;  %v915_v32 = vpop.f32.mrf.mxu1 }
 0x1dd   : > { %v887_v35 = vadd.f32 %v886_v6, %v787_v5  ;;  %v916_v49 = vadd.f32 %v915_v32, %v816_v9 }
 0x1df   : > { %v2078_v12 = vpop.f32.mrf.mxu2 }
 0x1e0   : > { %v1025_v14 = vadd.f32 %v2078_v12, %v2074_v4 }
 0x1e1   : > { %v860_v13 = vpop.f32.mrf.mxu3 }
 0x1e2   : > { %v861_v47 = vadd.f32 %v860_v13, %v761_v53 }
 0x1e4   : > { %v889_v43 = vpop.f32.mrf.mxu0  ;;  %v918_v61 = vpop.f32.mrf.mxu1 }
 0x1e5   : > { %v890_v60 = vadd.f32 %v889_v43, %v790_v42  ;;  %v919_v6 = vadd.f32 %v918_v61, %v2076_v11 }
 0x1e7   : > { %v958_v16 = vpop.f32.mrf.mxu2 }
 0x1e8   : > { %v1028_v22 = vadd.f32 %v958_v16, %v855_v19 }
 0x1e9   : > { %v984_v18 = vpop.f32.mrf.mxu3 }
 0x1ea   : > { %v1064_v23 = vadd.f32 %v2080_v15, %v1028_v22  ;;  %v1026_v3 = vadd.f32 %v984_v18, %v881_v56 }
 0x1ec   : > { %v1013_v38 = vpop.f32.mrf.mxu0  ;;  %v1088_v27 = vmul.f32 0.2, %v1064_v23  ;;  %vm1076_vm15 = vcmp.ge.f32.partialorder %v1064_v23, 0.0  ;;  %v1062_v1 = vadd.f32 %v1044_v63, %v1026_v3 }
 0x1ed   : > { %v1027_v7 = vadd.f32 %v1013_v38, %v910_v57 }
 0x1ee   : > { %v1100_v36 = vsel %vm1076_vm15, %v1064_v23, %v1088_v27  ;;  %v1086_v4 = vmul.f32 0.2, %v1062_v1  ;;  %vm1074_vm10 = vcmp.ge.f32.partialorder %v1062_v1, 0.0 }
 0x1ef   : > { %v961_v59 = vpop.f32.mrf.mxu2  ;;  %v1063_v16 = vadd.f32 %v1044_v63, %v1027_v7  ;;  %v1169_v7 = vld [vmem:[%s2166_s6] sm:$0x1] }
 0x1f0   : > { %v1031_v29 = vadd.f32 %v961_v59, %v858_v25  ;;  %v1098_v27 = vsel %vm1074_vm10, %v1062_v1, %v1086_v4 }
 0x1f1   : > { %v987_v24 = vpop.f32.mrf.mxu3  ;;  %v1087_v25 = vmul.f32 0.2, %v1063_v16  ;;  %vm1075_vm9 = vcmp.ge.f32.partialorder %v1063_v16, 0.0 }
 0x1f2   : > { %v1029_v26 = vadd.f32 %v987_v24, %v884_v44  ;;  %v1067_v17 = vadd.f32 %v1054_v34, %v1031_v29  ;;  %v1061_v24 = vadd.f32 %v1044_v63, %v1025_v14 }
 0x1f3   : > { %v1099_v29 = vsel %vm1075_vm9, %v1063_v16, %v1087_v25 }
 0x1f4   : > { %v1065_v30 = vadd.f32 %v2080_v15, %v1029_v26  ;;  %v1016_v31 = vpop.f32.mrf.mxu0  ;;  %v1091_v50 = vmul.f32 0.2, %v1067_v17  ;;  %vm1079_vm3 = vcmp.ge.f32.partialorder %v1067_v17, 0.0  ;;  %vm1073_vm12 = vcmp.ge.f32.partialorder %v1061_v24, 0.0 }
 0x1f5   : > { %v1030_v13 = vadd.f32 %v1016_v31, %v913_v2  ;;  %v1582_v32 = vpack.i.bf16 %v1099_v29, %v1098_v27 }
 0x1f6   : > { %vm1077_vm2 = vcmp.ge.f32.partialorder %v1065_v30, 0.0  ;;  %v1089_v33 = vmul.f32 0.2, %v1065_v30  ;;  %v1103_v53 = vsel %vm1079_vm3, %v1067_v17, %v1091_v50  ;;  %v1244_v17 = vld [vmem:[#allocation2] sm:$0x1] }
 0x1f7   : > { %v964_v39 = vpop.f32.mrf.mxu2  ;;  %v1066_v11 = vadd.f32 %v2080_v15, %v1030_v13 }
 0x1f8   : > { %v2084_v37 = vsel %vm1077_vm2, %v1065_v30, %v1089_v33  ;;  %v1034_v21 = vadd.f32 %v964_v39, %v861_v47  ;;  %v1085_v30 = vmul.f32 0.2, %v1061_v24 }
 0x1f9   : > { %v990_v28 = vpop.f32.mrf.mxu3  ;;  %v1547_v40 = vpack.i.bf16 %v2084_v37, %v1100_v36  ;;  %v1090_v12 = vmul.f32 0.2, %v1066_v11  ;;  %vm1078_vm11 = vcmp.ge.f32.partialorder %v1066_v11, 0.0 }
 0x1fa   : > { %v1032_v48 = vadd.f32 %v990_v28, %v887_v35  ;;  %v1070_v62 = vadd.f32 %v1059_v46, %v1034_v21 }
 0x1fb   : > { %1548 = vrot.lane.b32.xlu0 %v1547_v40, %s1669_s28  ;;  %v1102_v31 = vsel %vm1078_vm11, %v1066_v11, %v1090_v12 }
 0x1fc   : > { %v1068_v51 = vadd.f32 %v1054_v34, %v1032_v48  ;;  %v1019_v52 = vpop.f32.mrf.mxu0  ;;  %v1094_v41 = vmul.f32 0.2, %v1070_v62  ;;  %vm1082_vm6 = vcmp.ge.f32.partialorder %v1070_v62, 0.0  ;;  %v1577_v33 = vpack.i.bf16 %v1102_v31, %v2084_v37 }
 0x1fd   : > { %v1033_v54 = vadd.f32 %v1019_v52, %v916_v49 }
 0x1fe   : > { %vm1080_vm4 = vcmp.ge.f32.partialorder %v1068_v51, 0.0  ;;  %v1092_v55 = vmul.f32 0.2, %v1068_v51  ;;  %v1106_v38 = vsel %vm1082_vm6, %v1070_v62, %v1094_v41  ;;  %v1413_v41 = vld [vmem:[%s2166_s6 + $0x2] sm:$0x1] }
 0x1ff   : > { %v1069_v58 = vadd.f32 %v1054_v34, %v1033_v54  ;;  %v1097_v34 = vsel %vm1073_vm12, %v1061_v24, %v1085_v30 }
 0x200   : > { %v1104_v0 = vsel %vm1080_vm4, %v1068_v51, %v1092_v55  ;;  %v1572_v35 = vpack.i.bf16 %v1098_v27, %v1097_v34 }
 0x201   : > { %v993_v9 = vpop.f32.mrf.mxu3  ;;  %v1552_v5 = vpack.i.bf16 %v1104_v0, %v1103_v53  ;;  %v1093_v10 = vmul.f32 0.2, %v1069_v58  ;;  %vm1081_vm5 = vcmp.ge.f32.partialorder %v1069_v58, 0.0 }
 0x202   : > { %v1035_v45 = vadd.f32 %v993_v9, %v890_v60 }
 0x203   : > { %1553 = vrot.lane.b32.xlu1 %v1552_v5, %s1669_s28  ;;  %v1105_v19 = vsel %vm1081_vm5, %v1069_v58, %v1093_v10 }
 0x204   : > { %v1071_v8 = vadd.f32 %v1059_v46, %v1035_v45  ;;  %v1022_v42 = vpop.f32.mrf.mxu0  ;;  %v1557_v44 = vpack.i.bf16 %v1105_v19, %v1104_v0 }
 0x205   : > { %v1036_v43 = vadd.f32 %v1022_v42, %v919_v6 }
 0x206   : > { %v1095_v18 = vmul.f32 0.2, %v1071_v8  ;;  %vm1083_vm7 = vcmp.ge.f32.partialorder %v1071_v8, 0.0 }
 0x207   : > { %v1072_v20 = vadd.f32 %v1059_v46, %v1036_v43 }
 0x208   : > { %v1107_v22 = vsel %vm1083_vm7, %v1071_v8, %v1095_v18 }
 0x209   : > { %vm1084_vm8 = vcmp.ge.f32.partialorder %v1072_v20, 0.0  ;;  %v1096_v59 = vmul.f32 0.2, %v1072_v20  ;;  %1187 = vmatpush.msrb.mxu1 %v1107_v22  ;;  %v1562_v23 = vpack.i.bf16 %v1107_v22, %v1106_v38 }
 0x20b   : > { %1188 = vmatpush.msrb.mxu1 %v1104_v0  ;;  %1558 = vrot.lane.b32.xlu1 %v1557_v44, %s1668_s27  ;;  %v1108_v26 = vsel %vm1084_vm8, %v1072_v20, %v1096_v59 }
 0x20c   : > { %1563 = vrot.lane.b32.xlu0 %v1562_v23, %s1669_s28  ;;  %v1567_v15 = vpack.i.bf16 %v1108_v26, %v1107_v22 }
 0x20d   : > { %1189 = vmatpush.msrb.mxu1 %v2084_v37  ;;  %v1410_v37 = vld [vmem:[%s2166_s6 + $0x1] sm:$0x1] }
 0x20e   : > { %1568 = vrot.lane.b32.xlu2 %v1567_v15, %s1668_s27 }
 0x20f   : > { %1190 = vmatpush.msrb.mxu1 %v1098_v27 }
 0x210   : > { %1411 = vmatmul.msk.f32.vlgmr.msrb.gmra.mxu1 %vm722_vm14, %v1410_v37 }
 0x213   : > { %1583 = vrot.lane.b32.xlu1 %v1582_v32, %s1668_s27 }
 0x214   : > { %1578 = vrot.lane.b32.xlu0 %v1577_v33, %s1668_s27  ;;  %s1603_s27 = scalar_lea.hbm %s1602_s26, 1 }
 0x215   : > { %p1604_p12 = scmp.ne.s32.totalorder %s1602_s26, %s1603_s27  ;;  %p1609_p2 = scmp.lt.s32.totalorder %s1607_s7, %s1603_s27 }
 0x216   : > { %1573 = vrot.lane.b32.xlu2 %v1572_v35, %s1669_s28 }
 0x217   : > { %p1605_p13 = pnand %p1604_p12, %p1758_p4  ;;  %p1610_p3 = por %p1609_p2, %p1608_p1 }
 0x219   : > { %p1606_p0 = pneg %p1605_p13 }
 0x21b   : > { %p1611_p5 = pnand %p1610_p3, %p1606_p0 }
 0x21e   : > { %1247 = vperm.xlu2 %1486, %v1244_v17  }
 0x268   : > { %v1569_v36 = vpop.permute.xlu2 %1568 }
 0x269   : > { %v1571_v39 = vunpack.i.h.bf16 %v1569_v36  ;;  %v1570_v28 = vunpack.i.l.bf16 %v1569_v36 }
 0x26b   : > { %v1164_v40 = vsel %vm374_vm1, %v1570_v28, %v1571_v39 }
 0x26c   : > { %1235 = vmatpush.msra.mxu3 %v1164_v40 }
 0x26d   : > { %v1549_v47 = vpop.permute.xlu0 %1548 }
 0x26e   : > { %v1551_v58 = vunpack.i.h.bf16 %v1549_v47  ;;  %v1550_v60 = vunpack.i.l.bf16 %v1549_v47 }
 0x270   : > { %v1574_v51 = vpop.permute.xlu2 %1573  ;;  %v1134_v3 = vsel %vm361_vm0, %v1550_v60, %v1551_v58 }
 0x271   : > { %v1576_v62 = vunpack.i.h.bf16 %v1574_v51  ;;  %v1575_v53 = vunpack.i.l.bf16 %v1574_v51 }
 0x273   : > { %v1133_v5 = vsel %vm361_vm0, %v1575_v53, %v1576_v62 }
 0x275   : > { %v1554_v46 = vpop.permute.xlu1 %1553 }
 0x276   : > { %v1556_v52 = vunpack.i.h.bf16 %v1554_v46  ;;  %v1555_v54 = vunpack.i.l.bf16 %v1554_v46 }
 0x278   : > { %v1135_v0 = vsel %vm361_vm0, %v1555_v54, %v1556_v52  ;;  %v1248_v43 = vpop.permute.xlu2 %1247 }
 0x279   : > { %v1250_v18 = vperm.slane %v1248_v43, 0 }
 0x27d   : > { %v1559_v48 = vpop.permute.xlu1 %1558 }
 0x27e   : > { %v1561_v49 = vunpack.i.h.bf16 %v1559_v48  ;;  %v1560_v50 = vunpack.i.l.bf16 %v1559_v48  ;;  %v1564_v21 = vpop.permute.xlu0 %1563 }
 0x27f   : > { %v1566_v55 = vunpack.i.h.bf16 %v1564_v21  ;;  %v1565_v56 = vunpack.i.l.bf16 %v1564_v21 }
 0x280   : > { %v1163_v57 = vsel %vm374_vm1, %v1560_v50, %v1561_v49 }
 0x281   : > { %v1136_v61 = vsel %vm361_vm0, %v1565_v56, %v1566_v55  ;;  %1236 = vmatpush.msra.mxu3 %v1163_v57 }
 0x282   : > { %1210 = vmatpush.msrb.mxu2 %v1136_v61 }
 0x284   : > { %1211 = vmatpush.msrb.mxu2 %v1135_v0 }
 0x285   : > { %v1584_v2 = vpop.permute.xlu1 %1583 }
 0x286   : > { %v1579_v9 = vpop.permute.xlu0 %1578  ;;  %1212 = vmatpush.msrb.mxu2 %v1134_v3  ;;  %v1586_v10 = vunpack.i.h.bf16 %v1584_v2  ;;  %v1585_v45 = vunpack.i.l.bf16 %v1584_v2 }
 0x287   : > { %v1581_v6 = vunpack.i.h.bf16 %v1579_v9  ;;  %v1580_v13 = vunpack.i.l.bf16 %v1579_v9 }
 0x288   : > { %1213 = vmatpush.msrb.mxu2 %v1133_v5  ;;  %v1161_v8 = vsel %vm374_vm1, %v1585_v45, %v1586_v10 }
 0x289   : > { %v1162_v63 = vsel %vm374_vm1, %v1580_v13, %v1581_v6  ;;  %1412 = vmatmul.msk.f32.vlgmr.msrb.gmra.mxu2 %vm722_vm14, %v1169_v7 }
 0x28a   : > { %1237 = vmatpush.msra.mxu3 %v1162_v63 }
 0x28c   : > { %1238 = vmatpush.msra.mxu3 %v1161_v8 }
 0x28d   : > { %1414 = vmatmul.msk.f32.vlgmr.msra.gmra.mxu3 %vm722_vm14, %v1413_v41  ;;  %v1192_v42 = vpop.f32.mrf.mxu1 }
 0x30c   : > { %v1215_v14 = vpop.f32.mrf.mxu2 }
 0x30d   : > { %v1216_v1 = vadd.f32 %v1215_v14, %v1192_v42 }
 0x310   : > { %v1240_v16 = vpop.f32.mrf.mxu3 }
 0x311   : > { %v1243_v19 = vadd.f32 %v1240_v16, %v1216_v1 }
 0x313   : > { %v1251_v11 = vadd.f32 %v1250_v18, %v1243_v19 }
 0x315   : > { %1252 = vst [vmem:[%s334_s22] sm:$0x1] %v1251_v11 }
 0x316   : > { %1614 = shalt.err (!%p1611_p5)
}
 0x317   : > { %1426 = dma.vmem_to_hbm [thread:$0]  (%p1758_p4), %s1266_s23, 16, %s1268_s24, %s1254_s25  }
 0x318 PF: > { %p1432_p6 = scmp.ge.s32.totalorder %s1665_s12, 2  ;;  %s1279_s15 = sand.u32 1, %s1645_s29  }
 0x319   : > { %s1280_s20 = scalar_lea.sflag [#allocation4], %s1279_s15 }
 0x31a   : > { %p1429_p7 = pnand %p1432_p6, %p1765_p8 }
 0x31c   : > { %p1430_p9 = pneg %p1429_p7 }
 0x31e   : > { %1640 = dma.done.wait (%p1430_p9), %s1280_s20, 16  }
 0x31f   : > { %1642 = vsyncadd (%p1430_p9), %s1280_s20, 4294967280  ;;  %s23_s12 = sadd.s32 1, %s1665_s12   ;;  %s2171_s29 = smov %s1649_s30 }
 0x320   : > { %p20_p10 = scmp.ge.s32.totalorder %s23_s12, 4   ;;  %s2172_s30 = smov %s1653_s9 }
 0x321   : > { %s2173_s9 = smov %s1771_s19  ;;  %s2174_s10 = smov %s1661_s11 }
 0x322   : > { %s2175_s11 = smov %s2177_s14  ;;  %22 = sbr.rel (!%p20_p10) target bundleno = 7 (0x7), region = 96 }
 0x327   :  { %1285 = vsyncpa [#allocation4], 1 }
 0x328   :  { %1287 = vsyncpa [#allocation4 + $0x1], 1 }

</bundles_post_ra>
